<compile_context>
chip_gen: v7x
topology: tpu7x:2x2x1
jax: 0.10.0
libtpu: 0.0.40
codegen_flags: <defaults>
</compile_context>

<pallas_src>
import functools

import jax
import jax.numpy as jnp
from jax.experimental import pallas as pl
from jax.experimental.pallas import tpu as pltpu

LANE = 128  # TPU lane width; class axis is padded to this for lane-dense stores


# ----------------------------------------------------------------------------
# Fused kernel: relu(x @ W + b) @ Wc -> padded scores tile, with per-row CE
# loss packed into lane n_classes and per-row correctness into lane
# n_classes+1. Features never leave VMEM; one lane-dense (TM, 128) store.
# ----------------------------------------------------------------------------
def fused_episode_kernel(lab_ref, x_ref, w_ref, b_ref, wc_ref, out_ref, *,
                         n_classes, compute_stats):
    # ---- backbone: feats = relu(x @ W + b); x arrives bf16, f32 accumulate
    feats = jnp.dot(x_ref[...], w_ref[...],
                    preferred_element_type=jnp.float32)            # (TM, F) f32
    feats = jnp.maximum(feats + b_ref[...], 0.0)                   # bias + ReLU

    # ---- head: scores = feats @ Wc (Wc zero-padded to CP lanes)
    scores = jnp.dot(feats.astype(jnp.bfloat16), wc_ref[...],
                     preferred_element_type=jnp.float32)           # (TM, CP) f32

    if not compute_stats:
        # Inference-only path: no exp / reductions / argmax / stat packing.
        out_ref[...] = scores
        return

    tm, cp = scores.shape
    lane = jax.lax.broadcasted_iota(jnp.int32, (tm, cp), 1)        # lane ids
    labels = lab_ref[...]                                          # (TM, 1) i32

    valid = lane < n_classes                                       # real classes
    onehot = lane == labels                                        # true class
    s_masked = jnp.where(valid, scores, jnp.float32(-1e30))        # (TM, CP)

    # ---- cross-entropy (max-subtracted logsumexp, f32)
    row_max = jnp.max(s_masked, axis=-1, keepdims=True)            # (TM, 1)
    denom = jnp.sum(jnp.exp(s_masked - row_max), axis=-1, keepdims=True)
    lse = row_max + jnp.log(denom)                                 # (TM, 1)
    true_logit = jnp.sum(jnp.where(onehot, scores, 0.0),
                         axis=-1, keepdims=True)                   # (TM, 1)
    per_row_loss = lse - true_logit                                # (TM, 1)

    # ---- argmax with first-index tie-break, integer domain
    is_max = s_masked == row_max
    pred = jnp.min(jnp.where(is_max, lane, cp), axis=-1, keepdims=True)
    correct = (pred == labels).astype(jnp.float32)                 # (TM, 1)

    # ---- pack loss / correctness into the (zero) padded class lanes
    out = jnp.where(lane == n_classes, per_row_loss, scores)
    out = jnp.where(lane == n_classes + 1, correct, out)
    out_ref[...] = out                                             # single store


def fused_episode(images_bf16, labels, w_bf16, b, wc_padded_bf16, *,
                  n_classes, tile_m=256, compute_stats=True):
    """One pallas_call: backbone + head (+ CE loss + correctness packing)."""
    n, d = images_bf16.shape
    f = w_bf16.shape[1]
    cp = wc_padded_bf16.shape[1]

    # Cap tile_m for tiny episodes (avoid over-padding), keep sublane multiple.
    tile_m = min(tile_m, max(8, ((n + 7) // 8) * 8))
    n_pad = pl.cdiv(n, tile_m) * tile_m
    if n_pad != n:
        # Pad tail rows; they are sliced away on the host before any reduction.
        images_bf16 = jnp.pad(images_bf16, ((0, n_pad - n), (0, 0)))
        labels = jnp.pad(labels, (0, n_pad - n))

    labels2d = labels.reshape(n_pad, 1).astype(jnp.int32)
    kernel = functools.partial(fused_episode_kernel,
                               n_classes=n_classes,
                               compute_stats=compute_stats)

    grid_m = n_pad // tile_m
    # Only shard across TensorCores when each core gets enough grid steps for
    # the pipeline to warm up (v7x guidance).
    semantics = ("parallel",) if grid_m >= 4 else ("arbitrary",)

    out = pl.pallas_call(
        kernel,
        out_shape=jax.ShapeDtypeStruct((n_pad, cp), jnp.float32),
        grid=(grid_m,),
        in_specs=[
            pl.BlockSpec((tile_m, 1), lambda i: (i, 0)),    # int32 labels
            pl.BlockSpec((tile_m, d), lambda i: (i, 0)),    # bf16 image rows
            pl.BlockSpec((d, f), lambda i: (0, 0)),         # W  (VMEM-resident)
            pl.BlockSpec((1, f), lambda i: (0, 0)),         # b  (VMEM-resident)
            pl.BlockSpec((f, cp), lambda i: (0, 0)),        # Wc (VMEM-resident)
        ],
        out_specs=pl.BlockSpec((tile_m, cp), lambda i: (i, 0)),
        compiler_params=pltpu.CompilerParams(dimension_semantics=semantics),
    )(labels2d, images_bf16, w_bf16, b, wc_padded_bf16)
    return out


# ----------------------------------------------------------------------------
# jit-wrapped episode paths: kernel + slice + reductions fuse into 1 dispatch.
# ----------------------------------------------------------------------------
@functools.partial(jax.jit, static_argnames=("n_classes", "tile_m"))
def _episode_stats_jit(images_bf16, labels, w_bf16, b, wc_bf16, *,
                       n_classes, tile_m):
    n = images_bf16.shape[0]
    out = fused_episode(images_bf16, labels, w_bf16, b, wc_bf16,
                        n_classes=n_classes, tile_m=tile_m, compute_stats=True)
    out = out[:n]                                  # drop padded tail rows
    scores = out[:, :n_classes]
    loss = jnp.sum(out[:, n_classes]) / n          # normalize by TRUE N
    correct = jnp.sum(out[:, n_classes + 1]).astype(jnp.int32)
    return scores, loss, correct


@functools.partial(jax.jit, static_argnames=("n_classes", "tile_m"))
def _episode_scores_jit(images_bf16, w_bf16, b, wc_bf16, *, n_classes, tile_m):
    n = images_bf16.shape[0]
    dummy = jnp.zeros((n,), jnp.int32)             # tiny (N,1) DMA; unused
    out = fused_episode(images_bf16, dummy, w_bf16, b, wc_bf16,
                        n_classes=n_classes, tile_m=tile_m, compute_stats=False)
    return out[:n, :n_classes]


# ----------------------------------------------------------------------------
# Thin JAX-side "module" mirroring AbstractMetaLearner's concrete pieces.
# ----------------------------------------------------------------------------
class PallasMetaLearner:
    def __init__(self, w, b, wc, x_shape=(2, 128), tile_m=256):
        assert x_shape[1] == w.shape[0]
        # compute_backbone_output_shape: static from the weight shape — no
        # device probe / extra compile.
        self.feature_dimension = int(w.shape[1])
        self.backbone_output_shape = (self.feature_dimension,)
        self.n_classes = int(wc.shape[1])
        self.tile_m = int(tile_m)

        # bf16 weights for the MXU (halves weight DMA bytes), f32 bias.
        self.w_bf16 = jnp.asarray(w, jnp.bfloat16)
        self.b = jnp.asarray(b, jnp.float32).reshape(1, -1)
        # Pad class axis to a lane multiple, leaving >= 2 free lanes for the
        # packed loss / correctness stats.
        cp = pl.cdiv(self.n_classes + 2, LANE) * LANE
        wc_padded = jnp.zeros((w.shape[1], cp), jnp.float32)
        wc_padded = wc_padded.at[:, : self.n_classes].set(
            jnp.asarray(wc, jnp.float32))
        self.wc_bf16 = wc_padded.astype(jnp.bfloat16)

    @staticmethod
    def _as_bf16(images):
        # Producer-side bf16 preferred; cast only if a caller supplies f32.
        return images if images.dtype == jnp.bfloat16 else images.astype(jnp.bfloat16)

    # One fused, jitted launch: scores, mean CE loss, #correct.
    def run_episode(self, query_images, query_labels):
        return _episode_stats_jit(self._as_bf16(query_images),
                                  query_labels.astype(jnp.int32),
                                  self.w_bf16, self.b, self.wc_bf16,
                                  n_classes=self.n_classes, tile_m=self.tile_m)

    def classification_scores(self, query_images):
        return _episode_scores_jit(self._as_bf16(query_images),
                                   self.w_bf16, self.b, self.wc_bf16,
                                   n_classes=self.n_classes, tile_m=self.tile_m)

    # NOTE: fused with the forward pass so features/scores never round-trip
    # through HBM; takes images+labels rather than precomputed scores.
    def compute_loss(self, query_images, query_labels):
        _, loss, _ = self.run_episode(query_images, query_labels)
        return loss

    def evaluate_on_one_task(self, query_images, query_labels):
        _, _, correct = self.run_episode(query_images, query_labels)
        return correct, query_labels.shape[0]

    # TODO(synk): forward / process_support_set are abstract in the reference
    # module (raise NotImplementedError); not implemented here.


if __name__ == "__main__":
    key = jax.random.PRNGKey(0)
    k_w, k_b, k_wc, k_x, k_y, k_x2, k_y2 = jax.random.split(key, 7)

    input_dim = 128          # x_shape = (2, 128) in the reference __init__
    feat_dim = 128
    n_classes = 5
    n_tasks = 64             # batch many tasks' query sets into one call
    n_query_per_task = 8
    n_query = n_tasks * n_query_per_task   # 512 rows -> real MXU M dimension

    # Deterministic synthetic parameters.
    w = jax.random.normal(k_w, (input_dim, feat_dim), dtype=jnp.float32) * 0.05
    b = jax.random.normal(k_b, (1, feat_dim), dtype=jnp.float32) * 0.01
    wc = jax.random.normal(k_wc, (feat_dim, n_classes), dtype=jnp.float32) * 0.05

    learner = PallasMetaLearner(w, b, wc, x_shape=(2, input_dim), tile_m=256)
    assert learner.feature_dimension == feat_dim

    # bf16 end-to-end query images (producer-side dtype, no wrapper cast).
    query_images = jax.random.normal(k_x, (n_query, input_dim), dtype=jnp.bfloat16)
    query_labels = jax.random.randint(k_y, (n_query,), 0, n_classes, dtype=jnp.int32)

    scores, loss, correct = learner.run_episode(query_images, query_labels)
    jax.block_until_ready((scores, loss, correct))

    # Pure-JAX reference with the same bf16-matmul / f32-accumulate path.
    w_bf16 = w.astype(jnp.bfloat16)
    wc_bf16 = wc.astype(jnp.bfloat16)

    def reference(images_bf16, labels):
        feats = jnp.maximum(
            jnp.dot(images_bf16, w_bf16, preferred_element_type=jnp.float32) + b,
            0.0)
        sc = jnp.dot(feats.astype(jnp.bfloat16), wc_bf16,
                     preferred_element_type=jnp.float32)
        onehot = jax.nn.one_hot(labels, n_classes, dtype=jnp.float32)
        lse = jax.scipy.special.logsumexp(sc, axis=-1)
        ls = jnp.mean(lse - jnp.sum(sc * onehot, axis=-1))
        cr = jnp.sum((jnp.argmax(sc, axis=-1) == labels).astype(jnp.int32))
        return sc, ls, cr

    scores_ref, loss_ref, correct_ref = reference(query_images, query_labels)
    assert jnp.allclose(scores, scores_ref, atol=1e-2, rtol=1e-2)
    assert jnp.allclose(loss, loss_ref, atol=1e-2, rtol=1e-2)
    assert int(correct) == int(correct_ref)

    # Scores-only inference path (no loss/argmax epilogue in the kernel).
    scores_only = learner.classification_scores(query_images)
    assert jnp.allclose(scores_only, scores_ref, atol=1e-2, rtol=1e-2)

    # Ragged episode (rows not a multiple of 8 / tile_m) exercises row padding.
    small_images = jax.random.normal(k_x2, (20, input_dim), dtype=jnp.bfloat16)
    small_labels = jax.random.randint(k_y2, (20,), 0, n_classes, dtype=jnp.int32)
    s_scores, s_loss, s_correct = learner.run_episode(small_images, small_labels)
    jax.block_until_ready((s_scores, s_loss, s_correct))
    sr_scores, sr_loss, sr_correct = reference(small_images, small_labels)
    assert jnp.allclose(s_scores, sr_scores, atol=1e-2, rtol=1e-2)
    assert jnp.allclose(s_loss, sr_loss, atol=1e-2, rtol=1e-2)
    assert int(s_correct) == int(sr_correct)

    print("KERNEL_OK")
</pallas_src>

<mosaic_0001>
module attributes {stable_mosaic.version = 11 : i64} {
  func.func @fused_episode_kernel(%arg0: i32, %arg1: memref<256x1xi32, #tpu.memory_space<vmem>>, %arg2: memref<256x128xbf16, #tpu.memory_space<vmem>>, %arg3: memref<128x128xbf16, #tpu.memory_space<vmem>>, %arg4: memref<1x128xf32, #tpu.memory_space<vmem>>, %arg5: memref<128x128xbf16, #tpu.memory_space<vmem>>, %arg6: memref<256x128xf32, #tpu.memory_space<vmem>>) attributes {dimension_semantics = [#tpu.dimension_semantics<arbitrary>], iteration_bounds = array<i64: 2>, scalar_prefetch = 0 : i64, scratch_operands = 0 : i64, tpu.core_type = #tpu.core_type<tc>, window_params = [{transform_indices = @transform_0, window_bounds = array<i64: 256, 1>}, {transform_indices = @transform_1, window_bounds = array<i64: 256, 128>}, {pipeline_mode = #tpu.pipeline_mode<synchronous>, transform_indices = @transform_2, window_bounds = array<i64: 128, 128>}, {pipeline_mode = #tpu.pipeline_mode<synchronous>, transform_indices = @transform_3, window_bounds = array<i64: 1, 128>}, {pipeline_mode = #tpu.pipeline_mode<synchronous>, transform_indices = @transform_4, window_bounds = array<i64: 128, 128>}, {transform_indices = @transform_5, window_bounds = array<i64: 256, 128>}]} {
    %c0 = arith.constant 0 : index
    %c0_0 = arith.constant 0 : index
    %0 = vector.load %arg2[%c0, %c0_0] : memref<256x128xbf16, #tpu.memory_space<vmem>>, vector<256x128xbf16>
    %c0_1 = arith.constant 0 : index
    %c0_2 = arith.constant 0 : index
    %1 = vector.load %arg3[%c0_1, %c0_2] : memref<128x128xbf16, #tpu.memory_space<vmem>>, vector<128x128xbf16>
    %cst = arith.constant dense<0.000000e+00> : vector<256x128xf32>
    %2 = tpu.matmul %0, %1, %cst {dimension_numbers = #tpu.dot_dimension_numbers<[1], [0], [0], [1], [0, 0, 1, 1], [], []>} : vector<256x128xbf16>, vector<128x128xbf16>, vector<256x128xf32> -> vector<256x128xf32>
    %c0_3 = arith.constant 0 : index
    %c0_4 = arith.constant 0 : index
    %3 = vector.load %arg4[%c0_3, %c0_4] : memref<1x128xf32, #tpu.memory_space<vmem>>, vector<1x128xf32>
    %4 = vector.broadcast %3 : vector<1x128xf32> to vector<256x128xf32>
    %5 = arith.addf %2, %4 : vector<256x128xf32>
    %cst_5 = arith.constant 0.000000e+00 : f32
    %6 = vector.broadcast %cst_5 : f32 to vector<256x128xf32>
    %7 = arith.maximumf %5, %6 : vector<256x128xf32>
    %8 = arith.truncf %7 : vector<256x128xf32> to vector<256x128xbf16>
    %c0_6 = arith.constant 0 : index
    %c0_7 = arith.constant 0 : index
    %9 = vector.load %arg5[%c0_6, %c0_7] : memref<128x128xbf16, #tpu.memory_space<vmem>>, vector<128x128xbf16>
    %cst_8 = arith.constant dense<0.000000e+00> : vector<256x128xf32>
    %10 = tpu.matmul %8, %9, %cst_8 {dimension_numbers = #tpu.dot_dimension_numbers<[1], [0], [0], [1], [0, 0, 1, 1], [], []>} : vector<256x128xbf16>, vector<128x128xbf16>, vector<256x128xf32> -> vector<256x128xf32>
    %11 = tpu.iota {dimensions = array<i32: 1>} : vector<256x128xi32>
    %c0_9 = arith.constant 0 : index
    %c0_10 = arith.constant 0 : index
    %12 = vector.load %arg1[%c0_9, %c0_10] : memref<256x1xi32, #tpu.memory_space<vmem>>, vector<256x1xi32>
    %c5_i32 = arith.constant 5 : i32
    %13 = vector.broadcast %c5_i32 : i32 to vector<256x128xi32>
    %14 = arith.cmpi slt, %11, %13 : vector<256x128xi32>
    %15 = vector.broadcast %12 : vector<256x1xi32> to vector<256x128xi32>
    %16 = arith.cmpi eq, %11, %15 : vector<256x128xi32>
    %cst_11 = arith.constant -1.000000e+30 : f32
    %17 = vector.broadcast %cst_11 : f32 to vector<256x128xf32>
    %18 = arith.select %14, %10, %17 : vector<256x128xi1>, vector<256x128xf32>
    %cst_12 = arith.constant dense<0xFF800000> : vector<256xf32>
    %19 = vector.multi_reduction <maximumf>, %18, %cst_12 [1] : vector<256x128xf32> to vector<256xf32>
    %20 = vector.shape_cast %19 : vector<256xf32> to vector<256x1xf32>
    %21 = vector.broadcast %20 : vector<256x1xf32> to vector<256x128xf32>
    %22 = arith.subf %18, %21 : vector<256x128xf32>
    %23 = math.exp %22 : vector<256x128xf32>
    %cst_13 = arith.constant dense<0.000000e+00> : vector<256xf32>
    %24 = vector.multi_reduction <add>, %23, %cst_13 [1] : vector<256x128xf32> to vector<256xf32>
    %25 = vector.shape_cast %24 : vector<256xf32> to vector<256x1xf32>
    %26 = math.log %25 : vector<256x1xf32>
    %27 = arith.addf %20, %26 : vector<256x1xf32>
    %cst_14 = arith.constant 0.000000e+00 : f32
    %28 = vector.broadcast %cst_14 : f32 to vector<256x128xf32>
    %29 = arith.select %16, %10, %28 : vector<256x128xi1>, vector<256x128xf32>
    %cst_15 = arith.constant dense<0.000000e+00> : vector<256xf32>
    %30 = vector.multi_reduction <add>, %29, %cst_15 [1] : vector<256x128xf32> to vector<256xf32>
    %31 = vector.shape_cast %30 : vector<256xf32> to vector<256x1xf32>
    %32 = arith.subf %27, %31 : vector<256x1xf32>
    %33 = vector.broadcast %20 : vector<256x1xf32> to vector<256x128xf32>
    %34 = arith.cmpf oeq, %18, %33 : vector<256x128xf32>
    %c128_i32 = arith.constant 128 : i32
    %35 = vector.broadcast %c128_i32 : i32 to vector<256x128xi32>
    %36 = arith.select %34, %11, %35 : vector<256x128xi1>, vector<256x128xi32>
    %cst_16 = arith.constant dense<2147483647> : vector<256xi32>
    %37 = vector.multi_reduction <minsi>, %36, %cst_16 [1] : vector<256x128xi32> to vector<256xi32>
    %38 = vector.shape_cast %37 : vector<256xi32> to vector<256x1xi32>
    %39 = arith.cmpi eq, %38, %12 : vector<256x1xi32>
    %40 = arith.extui %39 : vector<256x1xi1> to vector<256x1xi32>
    %41 = arith.sitofp %40 : vector<256x1xi32> to vector<256x1xf32>
    %c5_i32_17 = arith.constant 5 : i32
    %42 = vector.broadcast %c5_i32_17 : i32 to vector<256x128xi32>
    %43 = arith.cmpi eq, %11, %42 : vector<256x128xi32>
    %44 = vector.shape_cast %32 : vector<256x1xf32> to vector<256x1xf32>
    %45 = vector.broadcast %44 : vector<256x1xf32> to vector<256x128xf32>
    %46 = arith.select %43, %45, %10 : vector<256x128xi1>, vector<256x128xf32>
    %c6_i32 = arith.constant 6 : i32
    %47 = vector.broadcast %c6_i32 : i32 to vector<256x128xi32>
    %48 = arith.cmpi eq, %11, %47 : vector<256x128xi32>
    %49 = vector.shape_cast %41 : vector<256x1xf32> to vector<256x1xf32>
    %50 = vector.broadcast %49 : vector<256x1xf32> to vector<256x128xf32>
    %51 = arith.select %48, %50, %46 : vector<256x128xi1>, vector<256x128xf32>
    %c0_18 = arith.constant 0 : index
    %c0_19 = arith.constant 0 : index
    %52 = vector.load %arg6[%c0_18, %c0_19] : memref<256x128xf32, #tpu.memory_space<vmem>>, vector<256x128xf32>
    tpu.vector_store %arg6[%c0_18, %c0_19], %51 {strides = array<i32>} : memref<256x128xf32, #tpu.memory_space<vmem>>, vector<256x128xf32>,
    return
  }
  func.func @transform_0(%arg0: i32) -> (i32, i32) {
    %c0_i32 = arith.constant 0 : i32
    %c0_i32_0 = arith.constant 0 : i32
    return %arg0, %c0_i32 : i32, i32
  }
  func.func @transform_1(%arg0: i32) -> (i32, i32) {
    %c0_i32 = arith.constant 0 : i32
    %c0_i32_0 = arith.constant 0 : i32
    return %arg0, %c0_i32 : i32, i32
  }
  func.func @transform_2(%arg0: i32) -> (i32, i32) {
    %c0_i32 = arith.constant 0 : i32
    %c0_i32_0 = arith.constant 0 : i32
    %c0_i32_1 = arith.constant 0 : i32
    return %c0_i32, %c0_i32_0 : i32, i32
  }
  func.func @transform_3(%arg0: i32) -> (i32, i32) {
    %c0_i32 = arith.constant 0 : i32
    %c0_i32_0 = arith.constant 0 : i32
    %c0_i32_1 = arith.constant 0 : i32
    return %c0_i32, %c0_i32_0 : i32, i32
  }
  func.func @transform_4(%arg0: i32) -> (i32, i32) {
    %c0_i32 = arith.constant 0 : i32
    %c0_i32_0 = arith.constant 0 : i32
    %c0_i32_1 = arith.constant 0 : i32
    return %c0_i32, %c0_i32_0 : i32, i32
  }
  func.func @transform_5(%arg0: i32) -> (i32, i32) {
    %c0_i32 = arith.constant 0 : i32
    %c0_i32_0 = arith.constant 0 : i32
    return %arg0, %c0_i32 : i32, i32
  }
}

</mosaic_0001>

<bundles_post_ra>
// kernel: _episode_stats_jit.1
= control target key start
LH: loop header
LB: loop body
LE: loop exit
PB: predicated region body
PF: predicated region fallthrough
CT: control target
= control target key end

     0   :  { %s3007_s18 = smov 0   ;;  %s4587_s0 = inlined_call_operand.vmem [shape: s32[512,1], index: 0, kind: input, shape index: {}]   ;;  %s4588_s1 = inlined_call_operand.vmem [shape: bf16[512,128], index: 1, kind: input, shape index: {}]   ;;  %s4589_s2 = inlined_call_operand.vmem [shape: bf16[128,128], index: 2, kind: input, shape index: {}]   ;;  %s4590_s3 = inlined_call_operand.vmem [shape: f32[1,128], index: 3, kind: input, shape index: {}]   ;;  %s4591_s4 = inlined_call_operand.vmem [shape: bf16[128,128], index: 4, kind: input, shape index: {}]   ;;  %s4592_s5 = inlined_call_operand.vmem [shape: f32[512,128], index: 5, kind: output, shape index: {}]  }
   0x1 LB: > { %s2461_s19 = sadd.s32 4294967295, %s2973_s18   ;;  %p2465_p0 = scmp.ge.s32.totalorder %s2973_s18, 1  ;;  %s2973_s18 = sphi %s3007_s18, %s15_s18  }
   0x2   : > { %p199_p1 = scmp.lt.s32.totalorder %s2973_s18, 3 }
   0x4   : > { %p200_p2 = pnand %p2465_p0, %p199_p1 }
   0x6   : > { %203 = sbr.rel (%p200_p2) target bundleno = 1196 (0x4ac), region = 40 }
   0xd   : > { %v2775_v0 = vld [vmem:[%s4589_s2] sm:$0xff]   ;;  %s2466_s22 = sshll.u32 %s2461_s19, 5  ;;  %v2776_v1 = vld [vmem:[%s4589_s2 + $0x8] sm:$0xff]   ;;  %v2777_v2 = vld [vmem:[%s4589_s2 + $0x10] sm:$0xff]   ;;  %v2975_v32 = vmov 0  }
   0xe   : > { %p233_p3 = scmp.lt.s32.totalorder %s2466_s22, 63  ;;  %2587 = vmatprep.subr.bf16.mxu0 %v2775_v0  ;;  %v2778_v3 = vld [vmem:[%s4589_s2 + $0x18] sm:$0xff]   ;;  %v2779_v5 = vld [vmem:[%s4589_s2 + $0x20] sm:$0xff]   ;;  %v2780_v6 = vld [vmem:[%s4589_s2 + $0x28] sm:$0xff]   ;;  %2694 = vset.pattern.permute.xlu1 %v2975_v32 }
   0xf   : > { %2588 = vmatpush3.bf16.msra.mxu0 %v2775_v0  ;;  %v2781_v7 = vld [vmem:[%s4589_s2 + $0x30] sm:$0xff]   ;;  %v2782_v8 = vld [vmem:[%s4589_s2 + $0x38] sm:$0xff]   ;;  %v2799_v9 = vld [vmem:[%s4591_s4] sm:$0xff]   ;;  %2693 = vset.pattern.permute.xlu0 %v2975_v32 }
  0x10   : > { %s4919_s22 = smov (!%p233_p3, %s2466_s22), 63  ;;  %2589 = vmatprep.subr.bf16.mxu0 %v2776_v1  ;;  %v2800_v10 = vld [vmem:[%s4591_s4 + $0x8] sm:$0xff]   ;;  %2635 = vmatprep.subr.bf16.mxu1 %v2799_v9  ;;  %v2801_v11 = vld [vmem:[%s4591_s4 + $0x10] sm:$0xff]   ;;  %v2802_v14 = vld [vmem:[%s4591_s4 + $0x18] sm:$0xff]  }
  0x11   : > { %s2469_s27 = sshll.u32 %s4919_s22, 2  ;;  %2636 = vmatpush3.bf16.msra.mxu1 %v2799_v9  ;;  %v2803_v15 = vld [vmem:[%s4591_s4 + $0x20] sm:$0xff]   ;;  %v2804_v18 = vld [vmem:[%s4591_s4 + $0x28] sm:$0xff]   ;;  %v2805_v30 = vld [vmem:[%s4591_s4 + $0x30] sm:$0xff]   ;;  %s2467_s10 = sshll.u32 %s4919_s22, 3 }
  0x12   : > { %s3030_s30 = scalar_lea.vmem %s4588_s1, %s2469_s27  ;;  %2637 = vmatprep.subr.bf16.mxu1 %v2800_v10  ;;  %v2806_v31 = vld [vmem:[%s4591_s4 + $0x38] sm:$0xff]   ;;  %s3093_s13 = scalar_lea.vmem %s4587_s0, %s2467_s10 }
  0x13   : > { %2590 = vmatpush3.bf16.msra.mxu0 %v2776_v1  ;;  %v2783_v4 = vld [vmem:[%s3030_s30] sm:$0xff]   ;;  %v2784_v12 = vld [vmem:[%s3030_s30 + $0x8] sm:$0xff]   ;;  %v2785_v13 = vld [vmem:[%s3030_s30 + $0x10] sm:$0xff]   ;;  %s4430_s17 = scalar_lea.vmem %s4592_s5, %s2467_s10 }
  0x14   : > { %2591 = vmatprep.subr.bf16.mxu0 %v2777_v2  ;;  %2603 = vmatprep.mubr.bf16.mxu0 %v2783_v4  ;;  %v2786_v16 = vld [vmem:[%s3030_s30 + $0x18] sm:$0xff]   ;;  %v2787_v17 = vld [vmem:[%s3030_s30 + $0x20] sm:$0xff]   ;;  %v2788_v19 = vld [vmem:[%s3030_s30 + $0x28] sm:$0xff]  }
  0x15   : > { %2638 = vmatpush3.bf16.msra.mxu1 %v2800_v10  ;;  %v2789_v20 = vld [vmem:[%s3030_s30 + $0x30] sm:$0xff]   ;;  %v2790_v21 = vld [vmem:[%s3030_s30 + $0x38] sm:$0xff]   ;;  %v2791_v22 = vld [vmem:[%s3030_s30 + $0x40] sm:$0xff]  }
  0x16   : > { %2639 = vmatprep.subr.bf16.mxu1 %v2801_v11  ;;  %v2792_v23 = vld [vmem:[%s3030_s30 + $0x48] sm:$0xff]   ;;  %v2793_v24 = vld [vmem:[%s3030_s30 + $0x50] sm:$0xff]   ;;  %v2794_v25 = vld [vmem:[%s3030_s30 + $0x58] sm:$0xff]  }
  0x17   : > { %2592 = vmatpush3.bf16.msra.mxu0 %v2777_v2  ;;  %v2795_v26 = vld [vmem:[%s3030_s30 + $0x60] sm:$0xff]   ;;  %v2796_v27 = vld [vmem:[%s3030_s30 + $0x68] sm:$0xff]   ;;  %v2797_v28 = vld [vmem:[%s3030_s30 + $0x70] sm:$0xff]  }
  0x18   : > { %2593 = vmatprep.subr.bf16.mxu0 %v2778_v3  ;;  %v2798_v29 = vld [vmem:[%s3030_s30 + $0x78] sm:$0xff]   ;;  %v888_v33 = vld [vmem:[%s3093_s13 + $0x10] sm:$0xff]  ;;  %v886_v35 = vld [vmem:[%s3093_s13] sm:$0xff] }
  0x19   : > { %2640 = vmatpush3.bf16.msra.mxu1 %v2801_v11  ;;  %926 = vperm.xlu1 %2694, %v888_v33   ;;  %v889_v34 = vld [vmem:[%s3093_s13 + $0x18] sm:$0xff]  ;;  %v891_v36 = vld [vmem:[%s3093_s13 + $0x28] sm:$0xff]  ;;  %v890_v39 = vld [vmem:[%s3093_s13 + $0x20] sm:$0xff] }
  0x1a   : > { %2641 = vmatprep.subr.bf16.mxu1 %v2802_v14  ;;  %920 = vperm.xlu0 %2693, %v886_v35   ;;  %v887_v37 = vld [vmem:[%s3093_s13 + $0x8] sm:$0xff]  ;;  %v893_v38 = vld [vmem:[%s3093_s13 + $0x38] sm:$0xff]  ;;  %v892_v41 = vld [vmem:[%s3093_s13 + $0x30] sm:$0xff] }
  0x1b   : > { %2594 = vmatpush3.bf16.msra.mxu0 %v2778_v3  ;;  %v895_v40 = vld [vmem:[%s3093_s13 + $0x48] sm:$0xff]  ;;  %v897_v42 = vld [vmem:[%s3093_s13 + $0x58] sm:$0xff]  ;;  %v894_v43 = vld [vmem:[%s3093_s13 + $0x40] sm:$0xff] }
  0x1c   : > { %2595 = vmatprep.subr.bf16.mxu0 %v2779_v5  ;;  %v899_v44 = vld [vmem:[%s3093_s13 + $0x68] sm:$0xff]  ;;  %v896_v45 = vld [vmem:[%s3093_s13 + $0x50] sm:$0xff]  ;;  %v901_v46 = vld [vmem:[%s3093_s13 + $0x78] sm:$0xff] }
  0x1d   : > { %2642 = vmatpush3.bf16.msra.mxu1 %v2802_v14  ;;  %929 = vperm.xlu1 %2694, %v889_v34   ;;  %v898_v47 = vld [vmem:[%s3093_s13 + $0x60] sm:$0xff]  ;;  %v903_v48 = vld [vmem:[%s3093_s13 + $0x88] sm:$0xff]  ;;  %v900_v49 = vld [vmem:[%s3093_s13 + $0x70] sm:$0xff] }
  0x1e   : > { %2643 = vmatprep.subr.bf16.mxu1 %v2803_v15  ;;  %923 = vperm.xlu0 %2693, %v887_v37   ;;  %v905_v50 = vld [vmem:[%s3093_s13 + $0x98] sm:$0xff]  ;;  %v902_v51 = vld [vmem:[%s3093_s13 + $0x80] sm:$0xff]  ;;  %v907_v52 = vld [vmem:[%s3093_s13 + $0xa8] sm:$0xff] }
  0x1f   : > { %2596 = vmatpush3.bf16.msra.mxu0 %v2779_v5  ;;  %v904_v53 = vld [vmem:[%s3093_s13 + $0x90] sm:$0xff]  ;;  %v909_v54 = vld [vmem:[%s3093_s13 + $0xb8] sm:$0xff]  ;;  %v906_v55 = vld [vmem:[%s3093_s13 + $0xa0] sm:$0xff] }
  0x20   : > { %2597 = vmatprep.subr.bf16.mxu0 %v2780_v6  ;;  %v911_v56 = vld [vmem:[%s3093_s13 + $0xc8] sm:$0xff]  ;;  %v908_v57 = vld [vmem:[%s3093_s13 + $0xb0] sm:$0xff]  ;;  %v913_v58 = vld [vmem:[%s3093_s13 + $0xd8] sm:$0xff] }
  0x21   : > { %2644 = vmatpush3.bf16.msra.mxu1 %v2803_v15  ;;  %935 = vperm.xlu1 %2694, %v891_v36   ;;  %v910_v59 = vld [vmem:[%s3093_s13 + $0xc0] sm:$0xff]  ;;  %v915_v60 = vld [vmem:[%s3093_s13 + $0xe8] sm:$0xff]  ;;  %v912_v61 = vld [vmem:[%s3093_s13 + $0xd0] sm:$0xff] }
  0x22   : > { %2645 = vmatprep.subr.bf16.mxu1 %v2804_v18  ;;  %932 = vperm.xlu0 %2693, %v890_v39   ;;  %v917_v62 = vld [vmem:[%s3093_s13 + $0xf8] sm:$0xff]  ;;  %v914_v63 = vld [vmem:[%s3093_s13 + $0xe0] sm:$0xff]  ;;  %v916_v0 = vld [vmem:[%s3093_s13 + $0xf0] sm:$0xff] }
  0x23   : > { %2598 = vmatpush3.bf16.msra.mxu0 %v2780_v6  ;;  %v3130_v1 = vld [vmem:[%s4590_s3] ss:$0 sm:$0xff] }
  0x24   : > { %2599 = vmatprep.subr.bf16.mxu0 %v2781_v7 }
  0x25   : > { %2646 = vmatpush3.bf16.msra.mxu1 %v2804_v18  ;;  %941 = vperm.xlu1 %2694, %v893_v38  }
  0x26   : > { %2647 = vmatprep.subr.bf16.mxu1 %v2805_v30  ;;  %938 = vperm.xlu0 %2693, %v892_v41  }
  0x27   : > { %2600 = vmatpush3.bf16.msra.mxu0 %v2781_v7 }
  0x28   : > { %2601 = vmatprep.subr.bf16.mxu0 %v2782_v8 }
  0x29   : > { %2648 = vmatpush3.bf16.msra.mxu1 %v2805_v30  ;;  %947 = vperm.xlu1 %2694, %v895_v40  }
  0x2a   : > { %2649 = vmatprep.subr.bf16.mxu1 %v2806_v31  ;;  %944 = vperm.xlu0 %2693, %v894_v43  }
  0x2b   : > { %2602 = vmatpush3.bf16.msra.mxu0 %v2782_v8 }
  0x2d   : > { %2650 = vmatpush3.bf16.msra.mxu1 %v2806_v31  ;;  %953 = vperm.xlu1 %2694, %v897_v42  }
  0x2e   : > { %2604 = vmatmul.mubr.bf16.vlgmr.msra.gmra.mrb[0].mxu0 %v2784_v12  ;;  %950 = vperm.xlu0 %2693, %v896_v45  }
  0x2f   : > { %2607 = vmatprep.mubr.bf16.mxu0 %v2785_v13 }
  0x31   : > { %959 = vperm.xlu1 %2694, %v899_v44  }
  0x32   : > { %956 = vperm.xlu0 %2693, %v898_v47  }
  0x35   : > { %965 = vperm.xlu1 %2694, %v901_v46  }
  0x36   : > { %2608 = vmatmul.mubr.bf16.gmra.mrb[4].mxu0 %v2786_v16  ;;  %962 = vperm.xlu0 %2693, %v900_v49  }
  0x37   : > { %2611 = vmatprep.mubr.bf16.mxu0 %v2787_v17 }
  0x39   : > { %971 = vperm.xlu1 %2694, %v903_v48  }
  0x3a   : > { %968 = vperm.xlu0 %2693, %v902_v51  }
  0x3d   : > { %977 = vperm.xlu1 %2694, %v905_v50  }
  0x3e   : > { %2612 = vmatmul.mubr.bf16.gmra.mrb[8].mxu0 %v2788_v19  ;;  %974 = vperm.xlu0 %2693, %v904_v53  }
  0x3f   : > { %2615 = vmatprep.mubr.bf16.mxu0 %v2789_v20 }
  0x41   : > { %983 = vperm.xlu1 %2694, %v907_v52  }
  0x42   : > { %980 = vperm.xlu0 %2693, %v906_v55  }
  0x45   : > { %989 = vperm.xlu1 %2694, %v909_v54  }
  0x46   : > { %2616 = vmatmul.mubr.bf16.gmra.mrb[12].mxu0 %v2790_v21  ;;  %986 = vperm.xlu0 %2693, %v908_v57  }
  0x47   : > { %2619 = vmatprep.mubr.bf16.mxu0 %v2791_v22 }
  0x49   : > { %995 = vperm.xlu1 %2694, %v911_v56  }
  0x4a   : > { %992 = vperm.xlu0 %2693, %v910_v59  }
  0x4d   : > { %1001 = vperm.xlu1 %2694, %v913_v58  }
  0x4e   : > { %2620 = vmatmul.mubr.bf16.gmra.mrb[16].mxu0 %v2792_v23  ;;  %998 = vperm.xlu0 %2693, %v912_v61  }
  0x4f   : > { %2623 = vmatprep.mubr.bf16.mxu0 %v2793_v24 }
  0x51   : > { %1007 = vperm.xlu1 %2694, %v915_v60  }
  0x52   : > { %1004 = vperm.xlu0 %2693, %v914_v63  }
  0x55   : > { %1013 = vperm.xlu1 %2694, %v917_v62  }
  0x56   : > { %2624 = vmatmul.mubr.bf16.gmra.mrb[20].mxu0 %v2794_v25  ;;  %1010 = vperm.xlu0 %2693, %v916_v0  }
  0x57   : > { %2627 = vmatprep.mubr.bf16.mxu0 %v2795_v26 }
  0x5e   : > { %2628 = vmatmul.mubr.bf16.gmra.mrb[24].mxu0 %v2796_v27 }
  0x5f   : > { %2631 = vmatprep.mubr.bf16.mxu0 %v2797_v28 }
  0x66   : > { %2632 = vmatmul.mubr.bf16.gmra.mrb[28].mxu0 %v2798_v29 }
 0x101   : > { %v2605_v2 = vpop.f32.mrb[0].mxu0 }
 0x102   : > { %v493_v3 = vadd.f32 %v2605_v2, %v3130_v1  ;;  %v484_v4 = vpop.f32.mrb[1].mxu0 }
 0x103   : > { %v485_v5 = vadd.f32 %v3130_v1, %v484_v4  ;;  %v2606_v6 = vpop.f32.mrb[2].mxu0 }
 0x104   : > { %v496_v7 = vadd.f32 %v2606_v6, %v3130_v1  ;;  %v487_v8 = vpop.f32.mrb[3].mxu0  ;;  %v613_v10 = vmax.f32 %v493_v3, 0.0 }
 0x105   : > { %v488_v9 = vadd.f32 %v3130_v1, %v487_v8  ;;  %v611_v12 = vmax.f32 %v485_v5, 0.0 }
 0x106   : > { %v614_v11 = vmax.f32 %v496_v7, 0.0 }
 0x107   : > { %v612_v13 = vmax.f32 %v488_v9, 0.0 }
 0x108   : > { %v644_v14 = vpack.c.bf16 %v614_v11, %v613_v10 }
 0x109   : > { %v2609_v15 = vpop.f32.mrb[4].mxu0  ;;  %v643_v16 = vpack.c.bf16 %v612_v13, %v611_v12 }
 0x10a   : > { %v509_v17 = vadd.f32 %v2609_v15, %v3130_v1  ;;  %v500_v18 = vpop.f32.mrb[5].mxu0 }
 0x10b   : > { %v501_v19 = vadd.f32 %v3130_v1, %v500_v18  ;;  %v2610_v20 = vpop.f32.mrb[6].mxu0  ;;  %2651 = vmatprep.mubr.bf16.mxu1 %v643_v16 }
 0x10c   : > { %v617_v21 = vmax.f32 %v509_v17, 0.0  ;;  %v512_v22 = vadd.f32 %v2610_v20, %v3130_v1  ;;  %v503_v23 = vpop.f32.mrb[7].mxu0  ;;  %2652 = vmatmul.mubr.bf16.vlgmr.msra.gmra.mrb[0].mxu1 %v644_v14 }
 0x10d   : > { %v615_v24 = vmax.f32 %v501_v19, 0.0  ;;  %v504_v25 = vadd.f32 %v3130_v1, %v503_v23 }
 0x10e   : > { %v618_v26 = vmax.f32 %v512_v22, 0.0 }
 0x10f   : > { %v616_v27 = vmax.f32 %v504_v25, 0.0 }
 0x110   : > { %v646_v28 = vpack.c.bf16 %v618_v26, %v617_v21 }
 0x111   : > { %v645_v29 = vpack.c.bf16 %v616_v27, %v615_v24  ;;  %v2613_v30 = vpop.f32.mrb[8].mxu0 }
 0x112   : > { %v525_v31 = vadd.f32 %v2613_v30, %v3130_v1  ;;  %v516_v32 = vpop.f32.mrb[9].mxu0 }
 0x113   : > { %v517_v33 = vadd.f32 %v3130_v1, %v516_v32  ;;  %v2614_v34 = vpop.f32.mrb[10].mxu0  ;;  %2655 = vmatprep.mubr.bf16.mxu1 %v645_v29 }
 0x114   : > { %v621_v35 = vmax.f32 %v525_v31, 0.0  ;;  %v528_v36 = vadd.f32 %v2614_v34, %v3130_v1  ;;  %v519_v37 = vpop.f32.mrb[11].mxu0  ;;  %2656 = vmatmul.mubr.bf16.gmra.mrb[4].mxu1 %v646_v28 }
 0x115   : > { %v619_v38 = vmax.f32 %v517_v33, 0.0  ;;  %v520_v39 = vadd.f32 %v3130_v1, %v519_v37 }
 0x116   : > { %v622_v40 = vmax.f32 %v528_v36, 0.0 }
 0x117   : > { %v620_v41 = vmax.f32 %v520_v39, 0.0 }
 0x118   : > { %v648_v42 = vpack.c.bf16 %v622_v40, %v621_v35 }
 0x119   : > { %v647_v43 = vpack.c.bf16 %v620_v41, %v619_v38  ;;  %v2617_v44 = vpop.f32.mrb[12].mxu0 }
 0x11a   : > { %v541_v45 = vadd.f32 %v2617_v44, %v3130_v1  ;;  %v532_v46 = vpop.f32.mrb[13].mxu0 }
 0x11b   : > { %v533_v47 = vadd.f32 %v3130_v1, %v532_v46  ;;  %v2618_v48 = vpop.f32.mrb[14].mxu0  ;;  %2659 = vmatprep.mubr.bf16.mxu1 %v647_v43 }
 0x11c   : > { %v625_v49 = vmax.f32 %v541_v45, 0.0  ;;  %v544_v50 = vadd.f32 %v2618_v48, %v3130_v1  ;;  %v535_v51 = vpop.f32.mrb[15].mxu0  ;;  %2660 = vmatmul.mubr.bf16.gmra.mrb[8].mxu1 %v648_v42 }
 0x11d   : > { %v623_v52 = vmax.f32 %v533_v47, 0.0  ;;  %v536_v53 = vadd.f32 %v3130_v1, %v535_v51  ;;  %v884_v51 = vlaneseq }
 0x11e   : > { %v626_v54 = vmax.f32 %v544_v50, 0.0 }
 0x11f   : > { %v624_v55 = vmax.f32 %v536_v53, 0.0  ;;  %v921_v53 = vpop.permute.xlu0 %920 }
 0x120   : > { %v650_v56 = vpack.c.bf16 %v626_v54, %v625_v49  ;;  %v927_v54 = vpop.permute.xlu1 %926 }
 0x121   : > { %v649_v57 = vpack.c.bf16 %v624_v55, %v623_v52  ;;  %v2621_v58 = vpop.f32.mrb[16].mxu0  ;;  %v3164_v52 = vand.u32 127, %v884_v51 }
 0x122   : > { %v557_v59 = vadd.f32 %v2621_v58, %v3130_v1  ;;  %v548_v60 = vpop.f32.mrb[17].mxu0 }
 0x123   : > { %v549_v61 = vadd.f32 %v3130_v1, %v548_v60  ;;  %v2622_v62 = vpop.f32.mrb[18].mxu0  ;;  %2663 = vmatprep.mubr.bf16.mxu1 %v649_v57  ;;  %vm1017_vm0 = vcmp.eq.s32.totalorder %v3164_v52, %v927_v54  ;;  %vm918_vm1 = vcmp.lt.s32.totalorder %v3164_v52, 5  ;;  %vm1015_vm2 = vcmp.eq.s32.totalorder %v3164_v52, %v921_v53 }
 0x124   : > { %v629_v63 = vmax.f32 %v557_v59, 0.0  ;;  %v560_v0 = vadd.f32 %v2622_v62, %v3130_v1  ;;  %v551_v2 = vpop.f32.mrb[19].mxu0  ;;  %2664 = vmatmul.mubr.bf16.gmra.mrb[12].mxu1 %v650_v56  ;;  %v924_v56 = vpop.permute.xlu0 %923 }
 0x125   : > { %v627_v3 = vmax.f32 %v549_v61, 0.0  ;;  %v552_v4 = vadd.f32 %v3130_v1, %v551_v2  ;;  %v930_v2 = vpop.permute.xlu1 %929  ;;  %vm1016_vm4 = vcmp.eq.s32.totalorder %v3164_v52, %v924_v56 }
 0x126   : > { %v630_v5 = vmax.f32 %v560_v0, 0.0  ;;  %vm1018_vm3 = vcmp.eq.s32.totalorder %v3164_v52, %v930_v2 }
 0x127   : > { %v628_v6 = vmax.f32 %v552_v4, 0.0 }
 0x128   : > { %v652_v7 = vpack.c.bf16 %v630_v5, %v629_v63  ;;  %v933_v63 = vpop.permute.xlu0 %932 }
 0x129   : > { %v651_v8 = vpack.c.bf16 %v628_v6, %v627_v3  ;;  %v2625_v9 = vpop.f32.mrb[20].mxu0  ;;  %vm1019_vm6 = vcmp.eq.s32.totalorder %v3164_v52, %v933_v63 }
 0x12a   : > { %v573_v10 = vadd.f32 %v2625_v9, %v3130_v1  ;;  %v564_v11 = vpop.f32.mrb[21].mxu0 }
 0x12b   : > { %v565_v12 = vadd.f32 %v3130_v1, %v564_v11  ;;  %v2626_v13 = vpop.f32.mrb[22].mxu0  ;;  %2667 = vmatprep.mubr.bf16.mxu1 %v651_v8 }
 0x12c   : > { %v633_v14 = vmax.f32 %v573_v10, 0.0  ;;  %v576_v15 = vadd.f32 %v2626_v13, %v3130_v1  ;;  %v567_v16 = vpop.f32.mrb[23].mxu0  ;;  %2668 = vmatmul.mubr.bf16.gmra.mrb[16].mxu1 %v652_v7  ;;  %v939_v9 = vpop.permute.xlu0 %938 }
 0x12d   : > { %v631_v17 = vmax.f32 %v565_v12, 0.0  ;;  %v568_v18 = vadd.f32 %v3130_v1, %v567_v16  ;;  %vm1021_vm5 = vcmp.eq.s32.totalorder %v3164_v52, %v939_v9  ;;  %v936_v12 = vpop.permute.xlu1 %935 }
 0x12e   : > { %v634_v19 = vmax.f32 %v576_v15, 0.0  ;;  %vm1020_vm8 = vcmp.eq.s32.totalorder %v3164_v52, %v936_v12 }
 0x12f   : > { %v632_v20 = vmax.f32 %v568_v18, 0.0 }
 0x130   : > { %v654_v21 = vpack.c.bf16 %v634_v19, %v633_v14 }
 0x131   : > { %v653_v22 = vpack.c.bf16 %v632_v20, %v631_v17  ;;  %v2629_v23 = vpop.f32.mrb[24].mxu0  ;;  %v942_v20 = vpop.permute.xlu1 %941 }
 0x132   : > { %v589_v24 = vadd.f32 %v2629_v23, %v3130_v1  ;;  %v580_v25 = vpop.f32.mrb[25].mxu0  ;;  %vm1022_vm7 = vcmp.eq.s32.totalorder %v3164_v52, %v942_v20 }
 0x133   : > { %v581_v26 = vadd.f32 %v3130_v1, %v580_v25  ;;  %v2630_v27 = vpop.f32.mrb[26].mxu0  ;;  %2671 = vmatprep.mubr.bf16.mxu1 %v653_v22  ;;  %v945_v22 = vpop.permute.xlu0 %944 }
 0x134   : > { %v637_v28 = vmax.f32 %v589_v24, 0.0  ;;  %v592_v29 = vadd.f32 %v2630_v27, %v3130_v1  ;;  %v583_v30 = vpop.f32.mrb[27].mxu0  ;;  %2672 = vmatmul.mubr.bf16.gmra.mrb[20].mxu1 %v654_v21  ;;  %vm1023_vm11 = vcmp.eq.s32.totalorder %v3164_v52, %v945_v22 }
 0x135   : > { %v635_v31 = vmax.f32 %v581_v26, 0.0  ;;  %v584_v32 = vadd.f32 %v3130_v1, %v583_v30 }
 0x136   : > { %v638_v33 = vmax.f32 %v592_v29, 0.0 }
 0x137   : > { %v636_v34 = vmax.f32 %v584_v32, 0.0  ;;  %v951_v30 = vpop.permute.xlu0 %950  ;;  %v948_v32 = vpop.permute.xlu1 %947 }
 0x138   : > { %v656_v35 = vpack.c.bf16 %v638_v33, %v637_v28  ;;  %vm1025_vm9 = vcmp.eq.s32.totalorder %v3164_v52, %v951_v30  ;;  %vm1024_vm12 = vcmp.eq.s32.totalorder %v3164_v52, %v948_v32 }
 0x139   : > { %v655_v36 = vpack.c.bf16 %v636_v34, %v635_v31  ;;  %v2633_v37 = vpop.f32.mrb[28].mxu0 }
 0x13a   : > { %v605_v38 = vadd.f32 %v2633_v37, %v3130_v1  ;;  %v596_v39 = vpop.f32.mrb[29].mxu0 }
 0x13b   : > { %v597_v40 = vadd.f32 %v3130_v1, %v596_v39  ;;  %v2634_v41 = vpop.f32.mrb[30].mxu0  ;;  %2675 = vmatprep.mubr.bf16.mxu1 %v655_v36 }
 0x13c   : > { %v641_v42 = vmax.f32 %v605_v38, 0.0  ;;  %v608_v43 = vadd.f32 %v2634_v41, %v3130_v1  ;;  %v599_v44 = vpop.f32.mrb[31].mxu0  ;;  %2676 = vmatmul.mubr.bf16.gmra.mrb[24].mxu1 %v656_v35 }
 0x13d   : > { %v639_v45 = vmax.f32 %v597_v40, 0.0  ;;  %v600_v46 = vadd.f32 %v3130_v1, %v599_v44 }
 0x13e   : > { %v642_v47 = vmax.f32 %v608_v43, 0.0  ;;  %v954_v43 = vpop.permute.xlu1 %953 }
 0x13f   : > { %v640_v48 = vmax.f32 %v600_v46, 0.0  ;;  %vm1026_vm10 = vcmp.eq.s32.totalorder %v3164_v52, %v954_v43 }
 0x140   : > { %v658_v49 = vpack.c.bf16 %v642_v47, %v641_v42 }
 0x141   : > { %v657_v50 = vpack.c.bf16 %v640_v48, %v639_v45  ;;  %v957_v45 = vpop.permute.xlu0 %956 }
 0x142   : > { %v960_v9 = vpop.permute.xlu1 %959  ;;  %vm1027_vm15 = vcmp.eq.s32.totalorder %v3164_v52, %v957_v45 }
 0x143   : > { %2679 = vmatprep.mubr.bf16.mxu1 %v657_v50 }
 0x144   : > { %2680 = vmatmul.mubr.bf16.gmra.mrb[28].mxu1 %v658_v49 }
 0x145   : > { %v963_v63 = vpop.permute.xlu0 %962 }
 0x146   : > { %vm1029_vm13 = vcmp.eq.s32.totalorder %v3164_v52, %v963_v63 }
 0x1df   : > { %v3168_v55 = vpop.f32.mrb[0].mxu1 }
 0x1e0   : > { %4670 = vst [vmem:[#allocation2_spill] sm:$0xff] %v3168_v55  ;;  %v3170_v57 = vpop.f32.mrb[1].mxu1  ;;  %v1401_v1 = vsel %vm1017_vm0, %v3168_v55, 0.0  ;;  %v3176_v58 = vsel %vm918_vm1, %v3168_v55, -1e+30  ;;  %vm1028_vm0 = vcmp.eq.s32.totalorder %v3164_v52, %v960_v9 }
 0x1e1   : > { %4671 = vst [vmem:[#allocation3_spill] sm:$0xff] %v3170_v57  ;;  %v3178_v59 = vpop.f32.mrb[2].mxu1  ;;  %1435 = vadd.xlane.f32.xlu1 %v1401_v1  ;;  %1083 = vmax.xlane.f32.xlu0 %v3176_v58  ;;  %v3187_v61 = vsel %vm918_vm1, %v3170_v57, -1e+30  ;;  %v1399_v62 = vsel %vm1015_vm2, %v3170_v57, 0.0 }
 0x1e2   : > { %4672 = vst [vmem:[#allocation4_spill] sm:$0xff] %v3178_v59  ;;  %v3182_v60 = vpop.f32.mrb[3].mxu1  ;;  %v3198_v4 = vsel %vm918_vm1, %v3178_v59, -1e+30  ;;  %v1402_v10 = vsel %vm1018_vm3, %v3178_v59, 0.0 }
 0x1e3   : > { %4673 = vst [vmem:[#allocation5_spill] sm:$0xff] %v3182_v60  ;;  %v3203_v5 = vsel %vm918_vm1, %v3182_v60, -1e+30  ;;  %v1400_v14 = vsel %vm1016_vm4, %v3182_v60, 0.0 }
 0x1e5   : > { %1079 = vmax.xlane.f32.xlu0 %v3187_v61  ;;  %1431 = vadd.xlane.f32.xlu1 %v1399_v62 }
 0x1e7   : > { %v3191_v0 = vpop.f32.mrb[4].mxu1 }
 0x1e8   : > { %4674 = vst [vmem:[#allocation6_spill] sm:$0xff] %v3191_v0  ;;  %v3193_v3 = vpop.f32.mrb[5].mxu1  ;;  %v3215_v8 = vsel %vm918_vm1, %v3191_v0, -1e+30  ;;  %v1405_v15 = vsel %vm1021_vm5, %v3191_v0, 0.0 }
 0x1e9   : > { %4675 = vst [vmem:[#allocation7_spill] sm:$0xff] %v3193_v3  ;;  %v3205_v6 = vpop.f32.mrb[6].mxu1  ;;  %1085 = vmax.xlane.f32.xlu0 %v3198_v4  ;;  %1081 = vmax.xlane.f32.xlu1 %v3203_v5  ;;  %v3239_v19 = vsel %vm918_vm1, %v3193_v3, -1e+30  ;;  %v1403_v25 = vsel %vm1019_vm6, %v3193_v3, 0.0 }
 0x1ea   : > { %4676 = vst [vmem:[#allocation8_spill] sm:$0xff] %v3205_v6  ;;  %v3210_v7 = vpop.f32.mrb[7].mxu1  ;;  %v3234_v18 = vsel %vm918_vm1, %v3205_v6, -1e+30  ;;  %v1406_v24 = vsel %vm1022_vm7, %v3205_v6, 0.0 }
 0x1eb   : > { %4677 = vst [vmem:[#allocation9_spill] sm:$0xff] %v3210_v7  ;;  %v3263_v29 = vsel %vm918_vm1, %v3210_v7, -1e+30  ;;  %v1404_v34 = vsel %vm1020_vm8, %v3210_v7, 0.0 }
 0x1ed   : > { %1437 = vadd.xlane.f32.xlu0 %v1402_v10  ;;  %1091 = vmax.xlane.f32.xlu1 %v3215_v8 }
 0x1ef   : > { %v3221_v11 = vpop.f32.mrb[8].mxu1 }
 0x1f0   : > { %4678 = vst [vmem:[#allocation10_spill] sm:$0xff] %v3221_v11  ;;  %v3223_v13 = vpop.f32.mrb[9].mxu1  ;;  %v3258_v28 = vsel %vm918_vm1, %v3221_v11, -1e+30  ;;  %v1409_v35 = vsel %vm1025_vm9, %v3221_v11, 0.0 }
 0x1f1   : > { %4679 = vst [vmem:[#allocation11_spill] sm:$0xff] %v3223_v13  ;;  %v3227_v16 = vpop.f32.mrb[10].mxu1  ;;  %1433 = vadd.xlane.f32.xlu0 %v1400_v14  ;;  %1443 = vadd.xlane.f32.xlu1 %v1405_v15  ;;  %v3280_v37 = vsel %vm918_vm1, %v3223_v13, -1e+30  ;;  %v1407_v48 = vsel %vm1023_vm11, %v3223_v13, 0.0 }
 0x1f2   : > { %4680 = vst [vmem:[#allocation12_spill] sm:$0xff] %v3227_v16  ;;  %v3229_v17 = vpop.f32.mrb[11].mxu1  ;;  %v3292_v40 = vsel %vm918_vm1, %v3227_v16, -1e+30  ;;  %v1410_v47 = vsel %vm1026_vm10, %v3227_v16, 0.0 }
 0x1f3   : > { %4681 = vst [vmem:[#allocation13_spill] sm:$0xff] %v3229_v17  ;;  %v3346_v62 = vsel %vm918_vm1, %v3229_v17, -1e+30  ;;  %v1408_v12 = vsel %vm1024_vm12, %v3229_v17, 0.0 }
 0x1f5   : > { %1093 = vmax.xlane.f32.xlu0 %v3234_v18  ;;  %1087 = vmax.xlane.f32.xlu1 %v3239_v19 }
 0x1f7   : > { %v3244_v21 = vpop.f32.mrb[12].mxu1 }
 0x1f8   : > { %4682 = vst [vmem:[#allocation14_spill] sm:$0xff] %v3244_v21  ;;  %v3247_v23 = vpop.f32.mrb[13].mxu1  ;;  %v3331_v54 = vsel %vm918_vm1, %v3244_v21, -1e+30  ;;  %v1413_v14 = vsel %vm1029_vm13, %v3244_v21, 0.0 }
 0x1f9   : > { %4683 = vst [vmem:[#allocation15_spill] sm:$0xff] %v3247_v23  ;;  %v3251_v26 = vpop.f32.mrb[14].mxu1  ;;  %1445 = vadd.xlane.f32.xlu0 %v1406_v24  ;;  %1439 = vadd.xlane.f32.xlu1 %v1403_v25  ;;  %v3368_v22 = vsel %vm918_vm1, %v3247_v23, -1e+30 }
 0x1fa   : > { %4684 = vst [vmem:[#allocation16_spill] sm:$0xff] %v3251_v26  ;;  %v3253_v27 = vpop.f32.mrb[15].mxu1  ;;  %v3380_v30 = vsel %vm918_vm1, %v3251_v26, -1e+30 }
 0x1fb   : > { %4685 = vst [vmem:[#allocation17_spill] sm:$0xff] %v3253_v27  ;;  %v1412_v55 = vsel %vm1028_vm0, %v3253_v27, 0.0 }
 0x1fd   : > { %1089 = vmax.xlane.f32.xlu0 %v3263_v29  ;;  %1099 = vmax.xlane.f32.xlu1 %v3258_v28 }
 0x1ff   : > { %v3267_v31 = vpop.f32.mrb[16].mxu1 }
 0x200   : > { %4686 = vst [vmem:[#allocation18_spill] sm:$0xff] %v3267_v31  ;;  %v3271_v33 = vpop.f32.mrb[17].mxu1  ;;  %v3419_v7 = vsel %vm918_vm1, %v3267_v31, -1e+30 }
 0x201   : > { %4687 = vst [vmem:[#allocation19_spill] sm:$0xff] %v3271_v33  ;;  %v3275_v36 = vpop.f32.mrb[18].mxu1  ;;  %1441 = vadd.xlane.f32.xlu0 %v1404_v34  ;;  %1451 = vadd.xlane.f32.xlu1 %v1409_v35  ;;  %v3285_v38 = vsel %vm918_vm1, %v3271_v33, -1e+30  ;;  %v966_v35 = vpop.permute.xlu1 %965 }
 0x202   : > { %4688 = vst [vmem:[#allocation20_spill] sm:$0xff] %v3275_v36  ;;  %v3287_v39 = vpop.f32.mrb[19].mxu1  ;;  %v3297_v41 = vsel %vm918_vm1, %v3275_v36, -1e+30  ;;  %vm1030_vm14 = vcmp.eq.s32.totalorder %v3164_v52, %v966_v35 }
 0x203   : > { %4689 = vst [vmem:[#allocation21_spill] sm:$0xff] %v3287_v39  ;;  %v3302_v42 = vsel %vm918_vm1, %v3287_v39, -1e+30  ;;  %v1414_v63 = vsel %vm1030_vm14, %v3251_v26, 0.0 }
 0x205   : > { %1101 = vmax.xlane.f32.xlu0 %v3292_v40  ;;  %1095 = vmax.xlane.f32.xlu1 %v3280_v37  ;;  %v972_v57 = vpop.permute.xlu1 %971 }
 0x206   : > { %vm1032_vm4 = vcmp.eq.s32.totalorder %v3164_v52, %v972_v57 }
 0x207   : > { %v3306_v44 = vpop.f32.mrb[20].mxu1 }
 0x208   : > { %4690 = vst [vmem:[#allocation22_spill] sm:$0xff] %v3306_v44  ;;  %v3310_v46 = vpop.f32.mrb[21].mxu1  ;;  %v3317_v49 = vsel %vm918_vm1, %v3306_v44, -1e+30 }
 0x209   : > { %4691 = vst [vmem:[#allocation23_spill] sm:$0xff] %v3310_v46  ;;  %v3319_v50 = vpop.f32.mrb[22].mxu1  ;;  %1453 = vadd.xlane.f32.xlu0 %v1410_v47  ;;  %1447 = vadd.xlane.f32.xlu1 %v1407_v48  ;;  %v3324_v51 = vsel %vm918_vm1, %v3310_v46, -1e+30  ;;  %v969_v47 = vpop.permute.xlu0 %968 }
 0x20a   : > { %4692 = vst [vmem:[#allocation24_spill] sm:$0xff] %v3319_v50  ;;  %v3326_v53 = vpop.f32.mrb[23].mxu1  ;;  %v3336_v56 = vsel %vm918_vm1, %v3319_v50, -1e+30  ;;  %vm1031_vm3 = vcmp.eq.s32.totalorder %v3164_v52, %v969_v47 }
 0x20b   : > { %4693 = vst [vmem:[#allocation25_spill] sm:$0xff] %v3326_v53  ;;  %v3341_v1 = vsel %vm918_vm1, %v3326_v53, -1e+30 }
 0x20d   : > { %1097 = vmax.xlane.f32.xlu0 %v3346_v62  ;;  %1107 = vmax.xlane.f32.xlu1 %v3331_v54  ;;  %v975_v60 = vpop.permute.xlu0 %974 }
 0x20e   : > { %vm1033_vm2 = vcmp.eq.s32.totalorder %v3164_v52, %v975_v60  ;;  %v1415_v60 = vsel %vm1031_vm3, %v3271_v33, 0.0 }
 0x20f   : > { %v3350_v2 = vpop.f32.mrb[24].mxu1  ;;  %v1417_v59 = vsel %vm1033_vm2, %v3267_v31, 0.0 }
 0x210   : > { %4694 = vst [vmem:[#allocation26_spill] sm:$0xff] %v3350_v2  ;;  %v3354_v10 = vpop.f32.mrb[25].mxu1  ;;  %v3361_v15 = vsel %vm918_vm1, %v3350_v2, -1e+30 }
 0x211   : > { %4695 = vst [vmem:[#allocation27_spill] sm:$0xff] %v3354_v10  ;;  %v3363_v20 = vpop.f32.mrb[26].mxu1  ;;  %1449 = vadd.xlane.f32.xlu0 %v1408_v12  ;;  %1459 = vadd.xlane.f32.xlu1 %v1413_v14  ;;  %v3373_v24 = vsel %vm918_vm1, %v3354_v10, -1e+30  ;;  %v1411_v12 = vsel %vm1027_vm15, %v3247_v23, 0.0  ;;  %v978_v23 = vpop.permute.xlu1 %977 }
 0x212   : > { %4696 = vst [vmem:[#allocation28_spill] sm:$0xff] %v3363_v20  ;;  %v3375_v25 = vpop.f32.mrb[27].mxu1  ;;  %v3385_v32 = vsel %vm918_vm1, %v3363_v20, -1e+30  ;;  %v981_v21 = vpop.permute.xlu0 %980 }
 0x213   : > { %4697 = vst [vmem:[#allocation29_spill] sm:$0xff] %v3375_v25  ;;  %v3390_v34 = vsel %vm918_vm1, %v3375_v25, -1e+30  ;;  %vm1035_vm7 = vcmp.eq.s32.totalorder %v3164_v52, %v981_v21 }
 0x215   : > { %1109 = vmax.xlane.f32.xlu0 %v3380_v30  ;;  %1103 = vmax.xlane.f32.xlu1 %v3368_v22 }
 0x217   : > { %v3394_v43 = vpop.f32.mrb[28].mxu1 }
 0x218   : > { %4698 = vst [vmem:[#allocation30_spill] sm:$0xff] %v3394_v43  ;;  %v3398_v48 = vpop.f32.mrb[29].mxu1  ;;  %v3405_v14 = vsel %vm918_vm1, %v3394_v43, -1e+30 }
 0x219   : > { %4699 = vst [vmem:[#allocation31_spill] sm:$0xff] %v3398_v48  ;;  %v3407_v16 = vpop.f32.mrb[30].mxu1  ;;  %1461 = vadd.xlane.f32.xlu0 %v1414_v63  ;;  %1455 = vadd.xlane.f32.xlu1 %v1411_v12  ;;  %v3412_v45 = vsel %vm918_vm1, %v3398_v48, -1e+30  ;;  %v3434_v12 = vsel %vm918_vm1, %v3253_v27, -1e+30 }
 0x21a   : > { %4700 = vst [vmem:[#allocation32_spill] sm:$0xff] %v3407_v16  ;;  %v3414_v35 = vpop.f32.mrb[31].mxu1  ;;  %v3424_v6 = vsel %vm918_vm1, %v3407_v16, -1e+30 }
 0x21b   : > { %4701 = vst [vmem:[#allocation33_spill] sm:$0xff] %v3414_v35  ;;  %v3429_v63 = vsel %vm918_vm1, %v3414_v35, -1e+30  ;;  %vm1034_vm1 = vcmp.eq.s32.totalorder %v3164_v52, %v978_v23  ;;  %v1416_v23 = vsel %vm1032_vm4, %v3287_v39, 0.0 }
 0x21c   : > { %v1418_v9 = vsel %vm1034_vm1, %v3275_v36, 0.0 }
 0x21d   : > { %1105 = vmax.xlane.f32.xlu0 %v3434_v12  ;;  %1115 = vmax.xlane.f32.xlu1 %v3419_v7 }
 0x221   : > { %1457 = vadd.xlane.f32.xlu0 %v1412_v55  ;;  %1467 = vadd.xlane.f32.xlu1 %v1417_v59  ;;  %v987_v55 = vpop.permute.xlu0 %986  ;;  %v984_v59 = vpop.permute.xlu1 %983 }
 0x222   : > { %vm1037_vm5 = vcmp.eq.s32.totalorder %v3164_v52, %v987_v55  ;;  %v1419_v55 = vsel %vm1035_vm7, %v3310_v46, 0.0  ;;  %vm1036_vm8 = vcmp.eq.s32.totalorder %v3164_v52, %v984_v59 }
 0x223   : > { %v1421_v47 = vsel %vm1037_vm5, %v3306_v44, 0.0 }
 0x225   : > { %1117 = vmax.xlane.f32.xlu0 %v3297_v41  ;;  %1111 = vmax.xlane.f32.xlu1 %v3285_v38 }
 0x229   : > { %1469 = vadd.xlane.f32.xlu0 %v1418_v9  ;;  %1463 = vadd.xlane.f32.xlu1 %v1415_v60  ;;  %v990_v9 = vpop.permute.xlu1 %989  ;;  %v993_v60 = vpop.permute.xlu0 %992 }
 0x22a   : > { %vm1038_vm6 = vcmp.eq.s32.totalorder %v3164_v52, %v990_v9  ;;  %v1420_v9 = vsel %vm1036_vm8, %v3326_v53, 0.0  ;;  %vm1039_vm11 = vcmp.eq.s32.totalorder %v3164_v52, %v993_v60 }
 0x22b   : > { %v1422_v57 = vsel %vm1038_vm6, %v3319_v50, 0.0 }
 0x22d   : > { %1113 = vmax.xlane.f32.xlu0 %v3302_v42  ;;  %1123 = vmax.xlane.f32.xlu1 %v3317_v49 }
 0x231   : > { %1465 = vadd.xlane.f32.xlu0 %v1416_v23  ;;  %1475 = vadd.xlane.f32.xlu1 %v1421_v47  ;;  %v999_v23 = vpop.permute.xlu0 %998  ;;  %v996_v47 = vpop.permute.xlu1 %995 }
 0x232   : > { %vm1041_vm9 = vcmp.eq.s32.totalorder %v3164_v52, %v999_v23  ;;  %v1423_v23 = vsel %vm1039_vm11, %v3354_v10, 0.0  ;;  %vm1040_vm12 = vcmp.eq.s32.totalorder %v3164_v52, %v996_v47 }
 0x233   : > { %v1425_v21 = vsel %vm1041_vm9, %v3350_v2, 0.0 }
 0x235   : > { %1125 = vmax.xlane.f32.xlu0 %v3336_v56  ;;  %1119 = vmax.xlane.f32.xlu1 %v3324_v51 }
 0x239   : > { %1477 = vadd.xlane.f32.xlu0 %v1422_v57  ;;  %1471 = vadd.xlane.f32.xlu1 %v1419_v55  ;;  %v1002_v57 = vpop.permute.xlu1 %1001  ;;  %v1005_v55 = vpop.permute.xlu0 %1004 }
 0x23a   : > { %vm1042_vm10 = vcmp.eq.s32.totalorder %v3164_v52, %v1002_v57  ;;  %vm1043_vm15 = vcmp.eq.s32.totalorder %v3164_v52, %v1005_v55 }
 0x23b   : > { %v1426_v59 = vsel %vm1042_vm10, %v3363_v20, 0.0  ;;  %v1427_v47 = vsel %vm1043_vm15, %v3398_v48, 0.0 }
 0x23d   : > { %1121 = vmax.xlane.f32.xlu0 %v3341_v1  ;;  %1131 = vmax.xlane.f32.xlu1 %v3361_v15  ;;  %v1011_v46 = vpop.permute.xlu0 %1010 }
 0x23e   : > { %vm1045_vm13 = vcmp.eq.s32.totalorder %v3164_v52, %v1011_v46 }
 0x23f   : > { %v1429_v60 = vsel %vm1045_vm13, %v3394_v43, 0.0 }
 0x241   : > { %1473 = vadd.xlane.f32.xlu0 %v1420_v9  ;;  %1483 = vadd.xlane.f32.xlu1 %v1425_v21  ;;  %v1008_v9 = vpop.permute.xlu1 %1007  ;;  %v1424_v21 = vsel %vm1040_vm12, %v3375_v25, 0.0 }
 0x242   : > { %vm1044_vm0 = vcmp.eq.s32.totalorder %v3164_v52, %v1008_v9 }
 0x243   : > { %v1428_v46 = vsel %vm1044_vm0, %v3414_v35, 0.0 }
 0x245   : > { %1133 = vmax.xlane.f32.xlu0 %v3385_v32  ;;  %1127 = vmax.xlane.f32.xlu1 %v3373_v24  ;;  %v1014_v57 = vpop.permute.xlu1 %1013 }
 0x246   : > { %vm1046_vm14 = vcmp.eq.s32.totalorder %v3164_v52, %v1014_v57 }
 0x249   : > { %1485 = vadd.xlane.f32.xlu0 %v1426_v59  ;;  %1479 = vadd.xlane.f32.xlu1 %v1423_v23  ;;  %v1430_v59 = vsel %vm1046_vm14, %v3407_v16, 0.0 }
 0x24d   : > { %1129 = vmax.xlane.f32.xlu0 %v3390_v34  ;;  %1139 = vmax.xlane.f32.xlu1 %v3405_v14 }
 0x251   : > { %1481 = vadd.xlane.f32.xlu0 %v1424_v21  ;;  %1491 = vadd.xlane.f32.xlu1 %v1429_v60 }
 0x255   : > { %1141 = vmax.xlane.f32.xlu0 %v3424_v6  ;;  %1135 = vmax.xlane.f32.xlu1 %v3412_v45 }
 0x259   : > { %1493 = vadd.xlane.f32.xlu0 %v1430_v59  ;;  %1487 = vadd.xlane.f32.xlu1 %v1427_v47 }
 0x25d   : > { %1137 = vmax.xlane.f32.xlu0 %v3429_v63 }
 0x261   : > { %1489 = vadd.xlane.f32.xlu0 %v1428_v46 }
 0x26e   : > { %v3487_v23 = vpop.xlane.xlu1 %1435  ;;  %v3489_v21 = vpop.xlane.xlu0 %1083 }
 0x26f   : > { %4702 = vst [vmem:[#allocation34_spill] sm:$0xff] %v3487_v23  ;;  %4703 = vst [vmem:[#allocation35_spill] sm:$0xff] %v3489_v21  ;;  %vm1529_vm2 = vcmp.eq.f32.partialorder %v3176_v58, %v3489_v21 }
 0x270   : > { %v3494_v55 = vsel %vm1529_vm2, %v3164_v52, 128 }
 0x271   : > { %v1620_v60 = vshra.s32 %v3494_v55, 16 }
 0x272   : > { %v3497_v57 = vpop.xlane.xlu1 %1431  ;;  %v3499_v59 = vpop.xlane.xlu0 %1079 }
 0x273   : > { %4704 = vst [vmem:[#allocation36_spill] sm:$0xff] %v3497_v57  ;;  %4705 = vst [vmem:[#allocation37_spill] sm:$0xff] %v3499_v59  ;;  %v3501_v9 = vcvt.s32.f32 %v1620_v60  ;;  %vm1527_vm1 = vcmp.eq.f32.partialorder %v3187_v61, %v3499_v59  ;;  %v1145_v57 = vsub.f32 %v3176_v58, %v3489_v21 }
 0x274   : > { %v3506_v47 = vsel %vm1527_vm1, %v3164_v52, 128 }
 0x275   : > { %1623 = vmin.xlane.f32.xlu1 %v3501_v9  ;;  %v1592_v46 = vshra.s32 %v3506_v47, 16 }
 0x276   : > { %v3510_v23 = vpop.xlane.xlu1 %1081  ;;  %v3512_v48 = vpop.xlane.xlu0 %1085 }
 0x277   : > { %4706 = vst [vmem:[#allocation38_spill] sm:$0xff] %v3510_v23  ;;  %4707 = vst [vmem:[#allocation39_spill] sm:$0xff] %v3512_v48  ;;  %vm1528_vm3 = vcmp.eq.f32.partialorder %v3203_v5, %v3510_v23  ;;  %v1146_v60 = vsub.f32 %v3198_v4, %v3512_v48  ;;  %v1144_v43 = vsub.f32 %v3203_v5, %v3510_v23  ;;  %v3524_v10 = vcvt.s32.f32 %v1592_v46 }
 0x278   : > { %vm1530_vm4 = vcmp.eq.f32.partialorder %v3198_v4, %v3512_v48  ;;  %v3530_v58 = vsel %vm1528_vm3, %v3164_v52, 128  ;;  %v1179_v23 = vmul.f32 1.442695, %v1145_v57  ;;  %v1143_v57 = vsub.f32 %v3187_v61, %v3499_v59 }
 0x279   : > { %v1181_v35 = vmul.f32 1.442695, %v1146_v60  ;;  %v3527_v16 = vsel %vm1530_vm4, %v3164_v52, 128  ;;  %1595 = vmin.xlane.f32.xlu1 %v3524_v10  ;;  %v1177_v4 = vmul.f32 1.442695, %v1144_v43  ;;  %v1606_v60 = vshra.s32 %v3530_v58, 16 }
 0x27a   : > { %v3533_v21 = vpop.xlane.xlu1 %1091  ;;  %v3535_v2 = vpop.xlane.xlu0 %1437  ;;  %v1634_v5 = vshra.s32 %v3527_v16, 16  ;;  %v1175_v20 = vmul.f32 1.442695, %v1143_v57 }
 0x27b   : > { %4708 = vst [vmem:[#allocation40_spill] sm:$0xff] %v3535_v2  ;;  %vm1533_vm5 = vcmp.eq.f32.partialorder %v3215_v8, %v3533_v21  ;;  %2807 = vpow2.f32 %v1181_v35  ;;  %v3553_v43 = vcvt.s32.f32 %v1606_v60 }
 0x27c   : > { %v3540_v46 = vcvt.s32.f32 %v1634_v5  ;;  %v3544_v48 = vsel %vm1533_vm5, %v3164_v52, 128  ;;  %2809 = vpow2.f32 %v1179_v23 }
 0x27d   : > { %2811 = vpow2.f32 %v1177_v4  ;;  %v1676_v35 = vshra.s32 %v3544_v48, 16 }
 0x27e   : > { %1637 = vmin.xlane.f32.xlu1 %v3540_v46  ;;  %v3547_v25 = vpop.xlane.xlu1 %1443  ;;  %v3549_v2 = vpop.xlane.xlu0 %1433  ;;  %2813 = vpow2.f32 %v1175_v20 }
 0x27f   : > { %4709 = vst [vmem:[#allocation41_spill] sm:$0xff] %v3549_v2  ;;  %v3565_v2 = vcvt.s32.f32 %v1676_v35 }
 0x282   : > { %1609 = vmin.xlane.f32.xlu1 %v3553_v43  ;;  %v3557_v5 = vpop.xlane.xlu1 %1087  ;;  %v3559_v44 = vpop.xlane.xlu0 %1093 }
 0x283   : > { %4710 = vst [vmem:[#allocation42_spill] sm:$0xff] %v3557_v5  ;;  %4711 = vst [vmem:[#allocation43_spill] sm:$0xff] %v3559_v44  ;;  %vm1531_vm6 = vcmp.eq.f32.partialorder %v3239_v19, %v3557_v5  ;;  %v1150_v23 = vsub.f32 %v3234_v18, %v3559_v44  ;;  %vm1534_vm7 = vcmp.eq.f32.partialorder %v3234_v18, %v3559_v44 }
 0x284   : > { %v3568_v4 = vsel %vm1531_vm6, %v3164_v52, 128 }
 0x285   : > { %v1189_v61 = vmul.f32 1.442695, %v1150_v23  ;;  %v2808_v60 = vpop.eup %2807  ;;  %v1648_v57 = vshra.s32 %v3568_v4, 16 }
 0x286   : > { %1679 = vmin.xlane.f32.xlu1 %v3565_v2  ;;  %v3571_v59 = vpop.xlane.xlu1 %1439  ;;  %v3573_v33 = vpop.xlane.xlu0 %1445  ;;  %1245 = vadd.xlane.f32.xlu0 %v2808_v60 }
 0x287   : > { %4712 = vst [vmem:[#allocation44_spill] sm:$0xff] %v3571_v59  ;;  %4713 = vst [vmem:[#allocation45_spill] sm:$0xff] %v3573_v33  ;;  %2815 = vpow2.f32 %v1189_v61  ;;  %v2810_v53 = vpop.eup %2809  ;;  %v3584_v33 = vcvt.s32.f32 %v1648_v57  ;;  %v3587_v61 = vsel %vm1534_vm7, %v3164_v52, 128 }
 0x288   : > { %v2812_v31 = vpop.eup %2811  ;;  %v1690_v60 = vshra.s32 %v3587_v61, 16 }
 0x289   : > { %v2814_v57 = vpop.eup %2813 }
 0x28a   : > { %1243 = vadd.xlane.f32.xlu1 %v2810_v53  ;;  %v3578_v35 = vpop.xlane.xlu1 %1099  ;;  %v3580_v23 = vpop.xlane.xlu0 %1089  ;;  %1241 = vadd.xlane.f32.xlu0 %v2812_v31  ;;  %v1149_v31 = vsub.f32 %v3215_v8, %v3533_v21  ;;  %v3608_v39 = vcvt.s32.f32 %v1690_v60 }
 0x28b   : > { %4714 = vst [vmem:[#allocation46_spill] sm:$0xff] %v3578_v35  ;;  %4715 = vst [vmem:[#allocation47_spill] sm:$0xff] %v3580_v23  ;;  %v1148_v50 = vsub.f32 %v3263_v29, %v3580_v23  ;;  %vm1532_vm8 = vcmp.eq.f32.partialorder %v3263_v29, %v3580_v23  ;;  %vm1537_vm9 = vcmp.eq.f32.partialorder %v3258_v28, %v3578_v35 }
 0x28d   : > { %v1185_v20 = vmul.f32 1.442695, %v1148_v50  ;;  %v3600_v50 = vsel %vm1532_vm8, %v3164_v52, 128 }
 0x28e   : > { %1651 = vmin.xlane.f32.xlu1 %v3584_v33  ;;  %v3592_v18 = vpop.xlane.xlu1 %1451  ;;  %v3594_v53 = vpop.xlane.xlu0 %1441  ;;  %v1662_v8 = vshra.s32 %v3600_v50, 16 }
 0x28f   : > { %4716 = vst [vmem:[#allocation48_spill] sm:$0xff] %v3592_v18  ;;  %4717 = vst [vmem:[#allocation49_spill] sm:$0xff] %v3594_v53  ;;  %2817 = vpow2.f32 %v1185_v20  ;;  %v1187_v53 = vmul.f32 1.442695, %v1149_v31  ;;  %v3612_v20 = vsel %vm1537_vm9, %v3164_v52, 128 }
 0x290   : > { %v3621_v13 = vcvt.s32.f32 %v1662_v8 }
 0x291   : > { %v2816_v44 = vpop.eup %2815  ;;  %2819 = vpow2.f32 %v1187_v53 }
 0x292   : > { %1239 = vadd.xlane.f32.xlu1 %v2814_v57  ;;  %v3604_v29 = vpop.xlane.xlu1 %1095  ;;  %v3606_v23 = vpop.xlane.xlu0 %1101  ;;  %1253 = vadd.xlane.f32.xlu0 %v2816_v44  ;;  %v1147_v57 = vsub.f32 %v3239_v19, %v3557_v5  ;;  %v1732_v44 = vshra.s32 %v3612_v20, 16 }
 0x293   : > { %4718 = vst [vmem:[#allocation50_spill] sm:$0xff] %v3604_v29  ;;  %4719 = vst [vmem:[#allocation51_spill] sm:$0xff] %v3606_v23  ;;  %vm1535_vm10 = vcmp.eq.f32.partialorder %v3280_v37, %v3604_v29  ;;  %v1154_v60 = vsub.f32 %v3292_v40, %v3606_v23  ;;  %vm1538_vm11 = vcmp.eq.f32.partialorder %v3292_v40, %v3606_v23 }
 0x294   : > { %v1183_v53 = vmul.f32 1.442695, %v1147_v57  ;;  %v3633_v19 = vcvt.s32.f32 %v1732_v44  ;;  %v3636_v8 = vsel %vm1535_vm10, %v3164_v52, 128 }
 0x295   : > { %v1197_v26 = vmul.f32 1.442695, %v1154_v60  ;;  %v1704_v3 = vshra.s32 %v3636_v8, 16 }
 0x296   : > { %1693 = vmin.xlane.f32.xlu1 %v3608_v39  ;;  %v3615_v36 = vpop.xlane.xlu1 %1447  ;;  %v3617_v27 = vpop.xlane.xlu0 %1453  ;;  %2821 = vpow2.f32 %v1183_v53 }
 0x297   : > { %4720 = vst [vmem:[#allocation52_spill] sm:$0xff] %v3615_v36  ;;  %4721 = vst [vmem:[#allocation53_spill] sm:$0xff] %v3617_v27  ;;  %2823 = vpow2.f32 %v1197_v26  ;;  %v3661_v26 = vsel %vm1538_vm11, %v3164_v52, 128 }
 0x298   : > { %v1746_v23 = vshra.s32 %v3661_v26, 16 }
 0x299   : > { %v2818_v31 = vpop.eup %2817 }
 0x29a   : > { %1665 = vmin.xlane.f32.xlu1 %v3621_v13  ;;  %v3629_v36 = vpop.xlane.xlu1 %1107  ;;  %v3631_v27 = vpop.xlane.xlu0 %1097  ;;  %1249 = vadd.xlane.f32.xlu0 %v2818_v31 }
 0x29b   : > { %4722 = vst [vmem:[#allocation54_spill] sm:$0xff] %v3629_v36  ;;  %4723 = vst [vmem:[#allocation55_spill] sm:$0xff] %v3631_v27  ;;  %v1152_v11 = vsub.f32 %v3346_v62, %v3631_v27  ;;  %v2820_v57 = vpop.eup %2819  ;;  %vm1536_vm13 = vcmp.eq.f32.partialorder %v3346_v62, %v3631_v27  ;;  %vm1541_vm14 = vcmp.eq.f32.partialorder %v3331_v54, %v3629_v36 }
 0x29c   : > { %v3691_v27 = vsel %vm1541_vm14, %v3164_v52, 128 }
 0x29d   : > { %v1193_v44 = vmul.f32 1.442695, %v1152_v11 }
 0x29e   : > { %1735 = vmin.xlane.f32.xlu1 %v3633_v19  ;;  %v3641_v18 = vpop.xlane.xlu1 %1459  ;;  %v3643_v17 = vpop.xlane.xlu0 %1449 }
 0x29f   : > { %4724 = vst [vmem:[#allocation56_spill] sm:$0xff] %v3641_v18  ;;  %4725 = vst [vmem:[#allocation57_spill] sm:$0xff] %v3643_v17  ;;  %v3654_v18 = vcvt.s32.f32 %v1704_v3  ;;  %2825 = vpow2.f32 %v1193_v44  ;;  %v1153_v3 = vsub.f32 %v3258_v28, %v3578_v35  ;;  %v3677_v44 = vsel %vm1536_vm13, %v3164_v52, 128 }
 0x2a0   : > { %v3687_v35 = vcvt.s32.f32 %v1746_v23 }
 0x2a2   : > { %1251 = vadd.xlane.f32.xlu1 %v2820_v57  ;;  %v3648_v31 = vpop.xlane.xlu1 %1103  ;;  %v3650_v60 = vpop.xlane.xlu0 %1109 }
 0x2a3   : > { %4726 = vst [vmem:[#allocation58_spill] sm:$0xff] %v3648_v31  ;;  %4727 = vst [vmem:[#allocation59_spill] sm:$0xff] %v3650_v60  ;;  %vm1542_vm12 = vcmp.eq.f32.partialorder %v3380_v30, %v3650_v60  ;;  %v1158_v62 = vsub.f32 %v3380_v30, %v3650_v60  ;;  %v1788_v60 = vshra.s32 %v3691_v27, 16  ;;  %vm1539_vm15 = vcmp.eq.f32.partialorder %v3368_v22, %v3648_v31 }
 0x2a4   : > { %v3657_v53 = vsel %vm1542_vm12, %v3164_v52, 128 }
 0x2a5   : > { %4728 = vst [vmem:[#allocation60_spill] sm:$0xff] %v3657_v53  ;;  %v1802_v17 = vshra.s32 %v3657_v53, 16  ;;  %v2822_v53 = vpop.eup %2821  ;;  %v1205_v59 = vmul.f32 1.442695, %v1158_v62 }
 0x2a6   : > { %1707 = vmin.xlane.f32.xlu1 %v3654_v18  ;;  %v3666_v11 = vpop.xlane.xlu1 %1455  ;;  %v3668_v40 = vpop.xlane.xlu0 %1461 }
 0x2a7   : > { %4729 = vst [vmem:[#allocation61_spill] sm:$0xff] %v3666_v11  ;;  %4730 = vst [vmem:[#allocation62_spill] sm:$0xff] %v3668_v40  ;;  %v3672_v57 = vcvt.s32.f32 %v1802_v17  ;;  %v1195_v17 = vmul.f32 1.442695, %v1153_v3  ;;  %v2824_v40 = vpop.eup %2823 }
 0x2a9   : > { %4731 = vst [vmem:[#allocation63_spill] sm:$0xff] %v3672_v57  ;;  %1805 = vmin.xlane.f32.xlu0 %v3672_v57  ;;  %v1718_v57 = vshra.s32 %v3677_v44, 16  ;;  %2827 = vpow2.f32 %v1195_v17  ;;  %v2826_v3 = vpop.eup %2825 }
 0x2aa   : > { %1247 = vadd.xlane.f32.xlu1 %v2822_v53  ;;  %v3683_v11 = vpop.xlane.xlu1 %1115  ;;  %v3685_v28 = vpop.xlane.xlu0 %1105  ;;  %v1151_v53 = vsub.f32 %v3280_v37, %v3604_v29  ;;  %2829 = vpow2.f32 %v1205_v59 }
 0x2ab   : > { %4732 = vst [vmem:[#allocation64_spill] sm:$0xff] %v3683_v11  ;;  %4733 = vst [vmem:[#allocation65_spill] sm:$0xff] %v3685_v28  ;;  %v3700_v23 = vcvt.s32.f32 %v1718_v57  ;;  %v3714_v57 = vcvt.s32.f32 %v1788_v60  ;;  %vm1540_vm2 = vcmp.eq.f32.partialorder %v3434_v12, %v3685_v28  ;;  %vm1545_vm3 = vcmp.eq.f32.partialorder %v3419_v7, %v3683_v11 }
 0x2ac   : > { %v1191_v37 = vmul.f32 1.442695, %v1151_v53 }
 0x2ad   : > { %1261 = vadd.xlane.f32.xlu0 %v2824_v40  ;;  %4736 = vst [vmem:[#allocation68_spill] sm:$0xff] %v3700_v23  ;;  %v1156_v40 = vsub.f32 %v3434_v12, %v3685_v28  ;;  %v3751_v12 = vsel %vm1540_vm2, %v3164_v52, 128 }
 0x2ae   : > { %1749 = vmin.xlane.f32.xlu1 %v3687_v35  ;;  %v3694_v5 = vpop.xlane.xlu1 %1467  ;;  %v3696_v30 = vpop.xlane.xlu0 %1457  ;;  %2831 = vpow2.f32 %v1191_v37  ;;  %v1157_v37 = vsub.f32 %v3331_v54, %v3629_v36 }
 0x2af   : > { %4734 = vst [vmem:[#allocation66_spill] sm:$0xff] %v3694_v5  ;;  %4735 = vst [vmem:[#allocation67_spill] sm:$0xff] %v3696_v30  ;;  %v3721_v5 = vsel %vm1539_vm15, %v3164_v52, 128  ;;  %v1201_v30 = vmul.f32 1.442695, %v1156_v40 }
 0x2b0   : > { %v1760_v60 = vshra.s32 %v3721_v5, 16 }
 0x2b1   : > { %1257 = vadd.xlane.f32.xlu0 %v2826_v3  ;;  %2833 = vpow2.f32 %v1201_v30 }
 0x2b2   : > { %1721 = vmin.xlane.f32.xlu1 %v3700_v23  ;;  %v3708_v62 = vpop.xlane.xlu1 %1111  ;;  %v3710_v17 = vpop.xlane.xlu0 %1117 }
 0x2b3   : > { %4737 = vst [vmem:[#allocation69_spill] sm:$0xff] %v3708_v62  ;;  %4738 = vst [vmem:[#allocation70_spill] sm:$0xff] %v3710_v17  ;;  %vm1546_vm0 = vcmp.eq.f32.partialorder %v3297_v41, %v3710_v17  ;;  %v2828_v23 = vpop.eup %2827  ;;  %v1162_v40 = vsub.f32 %v3297_v41, %v3710_v17  ;;  %vm1543_vm5 = vcmp.eq.f32.partialorder %v3285_v38, %v3708_v62 }
 0x2b4   : > { %v3717_v3 = vsel %vm1546_vm0, %v3164_v52, 128 }
 0x2b5   : > { %4739 = vst [vmem:[#allocation71_spill] sm:$0xff] %v3717_v3  ;;  %v1858_v59 = vshra.s32 %v3717_v3, 16 }
 0x2b6   : > { %1791 = vmin.xlane.f32.xlu1 %v3714_v57  ;;  %v3724_v29 = vpop.xlane.xlu1 %1463  ;;  %v3726_v0 = vpop.xlane.xlu0 %1469 }
 0x2b7   : > { %4740 = vst [vmem:[#allocation72_spill] sm:$0xff] %v3724_v29  ;;  %4741 = vst [vmem:[#allocation73_spill] sm:$0xff] %v3726_v0  ;;  %v3728_v53 = vcvt.s32.f32 %v1858_v59  ;;  %v2830_v59 = vpop.eup %2829  ;;  %v3744_v0 = vcvt.s32.f32 %v1760_v60  ;;  %v1203_v60 = vmul.f32 1.442695, %v1157_v37  ;;  %v1155_v37 = vsub.f32 %v3368_v22, %v3648_v31 }
 0x2b8   : > { %v2832_v28 = vpop.eup %2831 }
 0x2b9   : > { %4742 = vst [vmem:[#allocation74_spill] sm:$0xff] %v3728_v53  ;;  %1861 = vmin.xlane.f32.xlu0 %v3728_v53 }
 0x2ba   : > { %1259 = vadd.xlane.f32.xlu1 %v2828_v23  ;;  %v3736_v3 = vpop.xlane.xlu1 %1123  ;;  %v3738_v29 = vpop.xlane.xlu0 %1113  ;;  %v1213_v23 = vmul.f32 1.442695, %v1162_v40 }
 0x2bb   : > { %4743 = vst [vmem:[#allocation75_spill] sm:$0xff] %v3736_v3  ;;  %4744 = vst [vmem:[#allocation76_spill] sm:$0xff] %v3738_v29  ;;  %vm1544_vm1 = vcmp.eq.f32.partialorder %v3302_v42, %v3738_v29  ;;  %v1160_v40 = vsub.f32 %v3302_v42, %v3738_v29  ;;  %vm1549_vm7 = vcmp.eq.f32.partialorder %v3317_v49, %v3736_v3 }
 0x2bc   : > { %v3747_v30 = vsel %vm1544_vm1, %v3164_v52, 128  ;;  %2835 = vpow2.f32 %v1213_v23 }
 0x2bd   : > { %4745 = vst [vmem:[#allocation77_spill] sm:$0xff] %v3747_v30  ;;  %1269 = vadd.xlane.f32.xlu0 %v2830_v59  ;;  %v1830_v41 = vshra.s32 %v3747_v30, 16  ;;  %v1774_v59 = vshra.s32 %v3751_v12, 16  ;;  %v3765_v30 = vsel %vm1545_vm3, %v3164_v52, 128  ;;  %2837 = vpow2.f32 %v1203_v60 }
 0x2be   : > { %1763 = vmin.xlane.f32.xlu1 %v3744_v0  ;;  %v3756_v54 = vpop.xlane.xlu1 %1475  ;;  %v3758_v36 = vpop.xlane.xlu0 %1465  ;;  %v1844_v23 = vshra.s32 %v3765_v30, 16 }
 0x2bf   : > { %4746 = vst [vmem:[#allocation78_spill] sm:$0xff] %v3756_v54  ;;  %4747 = vst [vmem:[#allocation79_spill] sm:$0xff] %v3758_v36  ;;  %v3760_v17 = vcvt.s32.f32 %v1830_v41  ;;  %v2834_v41 = vpop.eup %2833  ;;  %v3777_v36 = vcvt.s32.f32 %v1774_v59  ;;  %v1199_v59 = vmul.f32 1.442695, %v1155_v37  ;;  %v1161_v37 = vsub.f32 %v3419_v7, %v3683_v11 }
 0x2c0   : > { %v3793_v29 = vcvt.s32.f32 %v1844_v23 }
 0x2c1   : > { %4748 = vst [vmem:[#allocation80_spill] sm:$0xff] %v3760_v17  ;;  %1833 = vmin.xlane.f32.xlu0 %v3760_v17  ;;  %v1211_v11 = vmul.f32 1.442695, %v1161_v37 }
 0x2c2   : > { %1255 = vadd.xlane.f32.xlu1 %v2832_v28  ;;  %v3769_v53 = vpop.xlane.xlu1 %1119  ;;  %v3771_v54 = vpop.xlane.xlu0 %1125  ;;  %v1209_v28 = vmul.f32 1.442695, %v1160_v40 }
 0x2c3   : > { %4749 = vst [vmem:[#allocation81_spill] sm:$0xff] %v3769_v53  ;;  %4750 = vst [vmem:[#allocation82_spill] sm:$0xff] %v3771_v54  ;;  %vm1550_vm4 = vcmp.eq.f32.partialorder %v3336_v56, %v3771_v54  ;;  %v1166_v40 = vsub.f32 %v3336_v56, %v3771_v54  ;;  %vm1547_vm9 = vcmp.eq.f32.partialorder %v3324_v51, %v3769_v53 }
 0x2c4   : > { %v3781_v17 = vsel %vm1550_vm4, %v3164_v52, 128  ;;  %2839 = vpow2.f32 %v1209_v28 }
 0x2c5   : > { %4751 = vst [vmem:[#allocation83_spill] sm:$0xff] %v3781_v17  ;;  %1265 = vadd.xlane.f32.xlu0 %v2834_v41  ;;  %v1914_v42 = vshra.s32 %v3781_v17, 16  ;;  %v3797_v41 = vsel %vm1543_vm5, %v3164_v52, 128  ;;  %2841 = vpow2.f32 %v1199_v59  ;;  %v1221_v59 = vmul.f32 1.442695, %v1166_v40 }
 0x2c6   : > { %1777 = vmin.xlane.f32.xlu1 %v3777_v36  ;;  %v3787_v22 = vpop.xlane.xlu1 %1471  ;;  %v3789_v60 = vpop.xlane.xlu0 %1477  ;;  %4755 = vst [vmem:[#allocation87_spill] sm:$0xff] %v3797_v41 }
 0x2c7   : > { %4752 = vst [vmem:[#allocation84_spill] sm:$0xff] %v3787_v22  ;;  %4753 = vst [vmem:[#allocation85_spill] sm:$0xff] %v3789_v60  ;;  %v3791_v31 = vcvt.s32.f32 %v1914_v42  ;;  %v2836_v23 = vpop.eup %2835  ;;  %v1816_v22 = vshra.s32 %v3797_v41, 16  ;;  %2843 = vpow2.f32 %v1221_v59 }
 0x2c8   : > { %v2838_v56 = vpop.eup %2837  ;;  %2845 = vpow2.f32 %v1211_v11 }
 0x2c9   : > { %4754 = vst [vmem:[#allocation86_spill] sm:$0xff] %v3791_v31  ;;  %1917 = vmin.xlane.f32.xlu0 %v3791_v31  ;;  %v3821_v31 = vcvt.s32.f32 %v1816_v22  ;;  %v1159_v22 = vsub.f32 %v3285_v38, %v3708_v62 }
 0x2ca   : > { %1847 = vmin.xlane.f32.xlu1 %v3793_v29  ;;  %v3802_v17 = vpop.xlane.xlu0 %1121  ;;  %v3806_v42 = vpop.xlane.xlu1 %1131 }
 0x2cb   : > { %4756 = vst [vmem:[#allocation88_spill] sm:$0xff] %v3802_v17  ;;  %4757 = vst [vmem:[#allocation89_spill] sm:$0xff] %v3806_v42  ;;  %vm1548_vm6 = vcmp.eq.f32.partialorder %v3341_v1, %v3802_v17  ;;  %v1207_v38 = vmul.f32 1.442695, %v1159_v22  ;;  %v1165_v22 = vsub.f32 %v3317_v49, %v3736_v3  ;;  %vm1553_vm11 = vcmp.eq.f32.partialorder %v3361_v15, %v3806_v42 }
 0x2cc   : > { %v3812_v28 = vsel %vm1548_vm6, %v3164_v52, 128 }
 0x2cd   : > { %4758 = vst [vmem:[#allocation90_spill] sm:$0xff] %v3812_v28  ;;  %1277 = vadd.xlane.f32.xlu0 %v2836_v23  ;;  %v1886_v60 = vshra.s32 %v3812_v28, 16  ;;  %v3827_v23 = vsel %vm1549_vm7, %v3164_v52, 128  ;;  %v1164_v28 = vsub.f32 %v3341_v1, %v3802_v17  ;;  %v1219_v3 = vmul.f32 1.442695, %v1165_v22 }
 0x2ce   : > { %1267 = vadd.xlane.f32.xlu1 %v2838_v56  ;;  %v3817_v7 = vpop.xlane.xlu0 %1473  ;;  %v3823_v41 = vpop.xlane.xlu1 %1483  ;;  %4761 = vst [vmem:[#allocation93_spill] sm:$0xff] %v3827_v23  ;;  %v1900_v37 = vshra.s32 %v3827_v23, 16  ;;  %v1163_v22 = vsub.f32 %v3324_v51, %v3769_v53 }
 0x2cf   : > { %4759 = vst [vmem:[#allocation91_spill] sm:$0xff] %v3817_v7  ;;  %v3819_v54 = vcvt.s32.f32 %v1886_v60  ;;  %4760 = vst [vmem:[#allocation92_spill] sm:$0xff] %v3823_v41  ;;  %v2840_v60 = vpop.eup %2839  ;;  %v1217_v11 = vmul.f32 1.442695, %v1164_v28 }
 0x2d0   : > { %v2842_v59 = vpop.eup %2841  ;;  %v3851_v17 = vcvt.s32.f32 %v1900_v37  ;;  %v1215_v53 = vmul.f32 1.442695, %v1163_v22 }
 0x2d1   : > { %1889 = vmin.xlane.f32.xlu0 %v3819_v54  ;;  %2847 = vpow2.f32 %v1217_v11  ;;  %v2844_v37 = vpop.eup %2843 }
 0x2d2   : > { %1819 = vmin.xlane.f32.xlu1 %v3821_v31  ;;  %v3832_v40 = vpop.xlane.xlu0 %1133  ;;  %v3847_v7 = vpop.xlane.xlu1 %1127  ;;  %4765 = vst [vmem:[#allocation97_spill] sm:$0xff] %v3851_v17  ;;  %2849 = vpow2.f32 %v1207_v38 }
 0x2d3   : > { %4762 = vst [vmem:[#allocation94_spill] sm:$0xff] %v3832_v40  ;;  %vm1554_vm8 = vcmp.eq.f32.partialorder %v3385_v32, %v3832_v40  ;;  %4764 = vst [vmem:[#allocation96_spill] sm:$0xff] %v3847_v7  ;;  %v1170_v23 = vsub.f32 %v3385_v32, %v3832_v40  ;;  %v2846_v11 = vpop.eup %2845  ;;  %vm1551_vm13 = vcmp.eq.f32.partialorder %v3373_v24, %v3847_v7 }
 0x2d4   : > { %v3840_v56 = vsel %vm1554_vm8, %v3164_v52, 128 }
 0x2d5   : > { %1273 = vadd.xlane.f32.xlu0 %v2840_v60  ;;  %v1970_v1 = vshra.s32 %v3840_v56, 16  ;;  %v3855_v60 = vsel %vm1547_vm9, %v3164_v52, 128  ;;  %v1229_v38 = vmul.f32 1.442695, %v1170_v23 }
 0x2d6   : > { %1263 = vadd.xlane.f32.xlu1 %v2842_v59  ;;  %v3845_v41 = vpop.xlane.xlu0 %1485  ;;  %4766 = vst [vmem:[#allocation98_spill] sm:$0xff] %v3855_v60  ;;  %v1872_v59 = vshra.s32 %v3855_v60, 16 }
 0x2d7   : > { %4763 = vst [vmem:[#allocation95_spill] sm:$0xff] %v3845_v41  ;;  %v3849_v62 = vcvt.s32.f32 %v1970_v1  ;;  %v3870_v41 = vpop.xlane.xlu1 %1479  ;;  %2851 = vpow2.f32 %v1229_v38 }
 0x2d8   : > { %4768 = vst [vmem:[#allocation100_spill] sm:$0xff] %v3870_v41  ;;  %v3879_v60 = vcvt.s32.f32 %v1872_v59  ;;  %2853 = vpow2.f32 %v1219_v3 }
 0x2d9   : > { %1973 = vmin.xlane.f32.xlu0 %v3849_v62 }
 0x2da   : > { %1903 = vmin.xlane.f32.xlu1 %v3851_v17  ;;  %v3860_v28 = vpop.xlane.xlu0 %1129  ;;  %4770 = vst [vmem:[#allocation102_spill] sm:$0xff] %v3879_v60  ;;  %v3883_v17 = vsel %vm1553_vm11, %v3164_v52, 128 }
 0x2db   : > { %4767 = vst [vmem:[#allocation99_spill] sm:$0xff] %v3860_v28  ;;  %vm1552_vm10 = vcmp.eq.f32.partialorder %v3390_v34, %v3860_v28  ;;  %4771 = vst [vmem:[#allocation103_spill] sm:$0xff] %v3883_v17  ;;  %v2848_v59 = vpop.eup %2847 }
 0x2dc   : > { %v3868_v1 = vsel %vm1552_vm10, %v3164_v52, 128 }
 0x2dd   : > { %1285 = vadd.xlane.f32.xlu0 %v2844_v37  ;;  %v1942_v32 = vshra.s32 %v3868_v1, 16  ;;  %v1168_v37 = vsub.f32 %v3390_v34, %v3860_v28  ;;  %v2850_v34 = vpop.eup %2849  ;;  %v1169_v28 = vsub.f32 %v3361_v15, %v3806_v42 }
 0x2de   : > { %1275 = vadd.xlane.f32.xlu1 %v2846_v11  ;;  %v3875_v49 = vpop.xlane.xlu0 %1481  ;;  %v3892_v11 = vpop.xlane.xlu1 %1139 }
 0x2df   : > { %4769 = vst [vmem:[#allocation101_spill] sm:$0xff] %v3875_v49  ;;  %v3877_v40 = vcvt.s32.f32 %v1942_v32  ;;  %4772 = vst [vmem:[#allocation104_spill] sm:$0xff] %v3892_v11  ;;  %v1956_v32 = vshra.s32 %v3883_v17, 16  ;;  %v1225_v3 = vmul.f32 1.442695, %v1168_v37  ;;  %v3917_v37 = vsel %vm1551_vm13, %v3164_v52, 128 }
 0x2e0   : > { %v1227_v22 = vmul.f32 1.442695, %v1169_v28  ;;  %vm1557_vm0 = vcmp.eq.f32.partialorder %v3405_v14, %v3892_v11  ;;  %vm2135_vm13 = vcmp.eq.s32.totalorder %v3164_v52, 5 }
 0x2e1   : > { %1945 = vmin.xlane.f32.xlu0 %v3877_v40  ;;  %2855 = vpow2.f32 %v1225_v3 }
 0x2e2   : > { %1875 = vmin.xlane.f32.xlu1 %v3879_v60  ;;  %v3888_v23 = vpop.xlane.xlu0 %1141  ;;  %v3911_v60 = vcvt.s32.f32 %v1956_v32  ;;  %2857 = vpow2.f32 %v1215_v53  ;;  %v1928_v32 = vshra.s32 %v3917_v37, 16 }
 0x2e3   : > { %vm1558_vm12 = vcmp.eq.f32.partialorder %v3424_v6, %v3888_v23  ;;  %v1174_v51 = vsub.f32 %v3424_v6, %v3888_v23 }
 0x2e4   : > { %v3898_v38 = vsel %vm1558_vm12, %v3164_v52, 128  ;;  %v3935_v42 = vcvt.s32.f32 %v1928_v32  ;;  %v1173_v32 = vsub.f32 %v3405_v14, %v3892_v11  ;;  %v1619_v14 = vand.u32 65535, %v3494_v55 }
 0x2e5   : > { %1281 = vadd.xlane.f32.xlu0 %v2848_v59  ;;  %v2026_v41 = vshra.s32 %v3898_v38, 16  ;;  %v3913_v59 = vpop.xlane.xlu1 %1491  ;;  %v1237_v6 = vmul.f32 1.442695, %v1174_v51 }
 0x2e6   : > { %1271 = vadd.xlane.f32.xlu1 %v2850_v34  ;;  %v3905_v49 = vpop.xlane.xlu0 %1493  ;;  %4774 = vst [vmem:[#allocation106_spill] sm:$0xff] %v3913_v59 }
 0x2e7   : > { %4773 = vst [vmem:[#allocation105_spill] sm:$0xff] %v3905_v49  ;;  %v3909_v17 = vcvt.s32.f32 %v2026_v41  ;;  %v2852_v41 = vpop.eup %2851  ;;  %2859 = vpow2.f32 %v1237_v6 }
 0x2e8   : > { %v2854_v3 = vpop.eup %2853  ;;  %2861 = vpow2.f32 %v1227_v22 }
 0x2e9   : > { %2029 = vmin.xlane.f32.xlu0 %v3909_v17  ;;  %v3931_v53 = vpop.xlane.xlu1 %1135 }
 0x2ea   : > { %1959 = vmin.xlane.f32.xlu1 %v3911_v60  ;;  %v3920_v34 = vpop.xlane.xlu0 %1137  ;;  %vm1555_vm15 = vcmp.eq.f32.partialorder %v3412_v45, %v3931_v53 }
 0x2eb   : > { %4775 = vst [vmem:[#allocation107_spill] sm:$0xff] %v3920_v34  ;;  %v1172_v15 = vsub.f32 %v3429_v63, %v3920_v34  ;;  %vm1556_vm14 = vcmp.eq.f32.partialorder %v3429_v63, %v3920_v34  ;;  %v1167_v63 = vsub.f32 %v3373_v24, %v3847_v7  ;;  %v2856_v6 = vpop.eup %2855  ;;  %v3944_v22 = vsel %vm1555_vm15, %v3164_v52, 128 }
 0x2ec   : > { %v3928_v59 = vsel %vm1556_vm14, %v3164_v52, 128  ;;  %v3952_v24 = vsel %vm1557_vm0, %v3164_v52, 128  ;;  %v1171_v7 = vsub.f32 %v3412_v45, %v3931_v53  ;;  %v1621_v45 = vcvt.s32.f32 %v1619_v14 }
 0x2ed   : > { %1293 = vadd.xlane.f32.xlu0 %v2852_v41  ;;  %v1998_v51 = vshra.s32 %v3928_v59, 16  ;;  %v1233_v49 = vmul.f32 1.442695, %v1172_v15  ;;  %v2858_v15 = vpop.eup %2857  ;;  %v1223_v41 = vmul.f32 1.442695, %v1167_v63  ;;  %v2012_v63 = vshra.s32 %v3952_v24, 16  ;;  %v3960_v11 = vpop.xlane.xlu1 %1487 }
 0x2ee   : > { %1283 = vadd.xlane.f32.xlu1 %v2854_v3  ;;  %v1984_v3 = vshra.s32 %v3944_v22, 16 }
 0x2ef   : > { %v3933_v28 = vcvt.s32.f32 %v1998_v51  ;;  %2863 = vpow2.f32 %v1233_v49 }
 0x2f0   : > { %2865 = vpow2.f32 %v1223_v41 }
 0x2f1   : > { %2001 = vmin.xlane.f32.xlu0 %v3933_v28  ;;  %v2860_v49 = vpop.eup %2859 }
 0x2f2   : > { %1931 = vmin.xlane.f32.xlu1 %v3935_v42  ;;  %v2862_v51 = vpop.eup %2861 }
 0x2f5   : > { %1289 = vadd.xlane.f32.xlu0 %v2856_v6  ;;  %v1235_v6 = vmul.f32 1.442695, %v1173_v32  ;;  %v1591_v32 = vand.u32 65535, %v3506_v47 }
 0x2f6   : > { %1279 = vadd.xlane.f32.xlu1 %v2858_v15  ;;  %v3956_v15 = vcvt.s32.f32 %v1984_v3 }
 0x2f7   : > { %2867 = vpow2.f32 %v1235_v6  ;;  %v1633_v6 = vand.u32 65535, %v3527_v16 }
 0x2f9   : > { %1301 = vadd.xlane.f32.xlu0 %v2860_v49  ;;  %v2864_v34 = vpop.eup %2863  ;;  %v1231_v49 = vmul.f32 1.442695, %v1171_v7  ;;  %v1593_v7 = vcvt.s32.f32 %v1591_v32 }
 0x2fa   : > { %1291 = vadd.xlane.f32.xlu1 %v2862_v51  ;;  %v3963_v51 = vcvt.s32.f32 %v2012_v63 }
 0x2fb   : > { %2869 = vpow2.f32 %v1231_v49  ;;  %v1635_v49 = vcvt.s32.f32 %v1633_v6 }
 0x2fd   : > { %1297 = vadd.xlane.f32.xlu0 %v2864_v34  ;;  %v2866_v34 = vpop.eup %2865 }
 0x2fe   : > { %1987 = vmin.xlane.f32.xlu1 %v3956_v15 }
 0x301   : > { %v2868_v63 = vpop.eup %2867 }
 0x302   : > { %2015 = vmin.xlane.f32.xlu1 %v3963_v51  ;;  %v3966_v41 = vpop.xlane.xlu1 %1623 }
 0x303   : > { %vm1625_vm2 = vcmp.eq.f32.partialorder %v3501_v9, %v3966_v41  ;;  %v1605_v9 = vand.u32 65535, %v3530_v58 }
 0x304   : > { %v1626_v55 = vsel %vm1625_vm2, %v1621_v45, inf }
 0x305   : > { %1627 = vmin.xlane.f32.xlu0 %v1626_v55  ;;  %v2870_v45 = vpop.eup %2869  ;;  %v1607_v32 = vcvt.s32.f32 %v1605_v9  ;;  %v1689_v9 = vand.u32 65535, %v3587_v61 }
 0x306   : > { %1287 = vadd.xlane.f32.xlu1 %v2866_v34  ;;  %v3971_v3 = vpop.xlane.xlu1 %1595 }
 0x307   : > { %vm1597_vm1 = vcmp.eq.f32.partialorder %v3524_v10, %v3971_v3  ;;  %v1675_v10 = vand.u32 65535, %v3544_v48 }
 0x308   : > { %v1598_v14 = vsel %vm1597_vm1, %v1593_v7, inf }
 0x309   : > { %1599 = vmin.xlane.f32.xlu0 %v1598_v14  ;;  %v1677_v58 = vcvt.s32.f32 %v1675_v10 }
 0x30a   : > { %1299 = vadd.xlane.f32.xlu1 %v2868_v63  ;;  %v1647_v63 = vand.u32 65535, %v3568_v4 }
 0x30b   : > { %v3976_v47 = vpop.xlane.xlu1 %1637 }
 0x30c   : > { %vm1639_vm3 = vcmp.eq.f32.partialorder %v3540_v46, %v3976_v47  ;;  %v1649_v48 = vcvt.s32.f32 %v1647_v63 }
 0x30d   : > { %v1640_v55 = vsel %vm1639_vm3, %v1635_v49, inf }
 0x30e   : > { %1295 = vadd.xlane.f32.xlu1 %v2870_v45  ;;  %1641 = vmin.xlane.f32.xlu0 %v1640_v55  ;;  %v4000_v45 = vpop.xlane.xlu0 %1489  ;;  %v1691_v55 = vcvt.s32.f32 %v1689_v9 }
 0x30f   : > { %v3981_v16 = vpop.xlane.xlu1 %1609 }
 0x310   : > { %vm1611_vm4 = vcmp.eq.f32.partialorder %v3553_v43, %v3981_v16 }
 0x311   : > { %v1612_v34 = vsel %vm1611_vm4, %v1607_v32, inf  ;;  %v1661_v32 = vand.u32 65535, %v3600_v50 }
 0x312   : > { %1613 = vmin.xlane.f32.xlu0 %v1612_v34 }
 0x313   : > { %v3986_v7 = vpop.xlane.xlu1 %1679  ;;  %v4005_v4 = vpop.xlane.xlu0 %1245  ;;  %v1663_v34 = vcvt.s32.f32 %v1661_v32 }
 0x314   : > { %vm1681_vm5 = vcmp.eq.f32.partialorder %v3565_v2, %v3986_v7 }
 0x315   : > { %v1682_v46 = vsel %vm1681_vm5, %v1677_v58, inf  ;;  %v1731_v58 = vand.u32 65535, %v3612_v20  ;;  %v1703_v20 = vand.u32 65535, %v3636_v8 }
 0x316   : > { %1683 = vmin.xlane.f32.xlu0 %v1682_v46 }
 0x317   : > { %v3990_v6 = vpop.xlane.xlu1 %1243  ;;  %v4014_v46 = vpop.xlane.xlu0 %1241  ;;  %v1733_v63 = vcvt.s32.f32 %v1731_v58 }
 0x318   : > { %4777 = vst [vmem:[#allocation109_spill] sm:$0xff] %v4014_v46  ;;  %v4811_v46 = vld [vmem:[#allocation90_spill] sm:$0xff] }
 0x31b   : > { %v3993_v14 = vpop.xlane.xlu1 %1651 }
 0x31c   : > { %vm1653_vm6 = vcmp.eq.f32.partialorder %v3584_v33, %v3993_v14 }
 0x31d   : > { %v1654_v43 = vsel %vm1653_vm6, %v1649_v48, inf }
 0x31e   : > { %1655 = vmin.xlane.f32.xlu0 %v1654_v43 }
 0x31f   : > { %v3997_v49 = vpop.xlane.xlu1 %1239  ;;  %v4020_v48 = vpop.xlane.xlu0 %1253 }
 0x320   : > { %4776 = vst [vmem:[#allocation108_spill] sm:$0xff] %v3997_v49  ;;  %4778 = vst [vmem:[#allocation110_spill] sm:$0xff] %v4020_v48 }
 0x323   : > { %v4002_v2 = vpop.xlane.xlu1 %1693 }
 0x324   : > { %vm1695_vm7 = vcmp.eq.f32.partialorder %v3608_v39, %v4002_v2 }
 0x325   : > { %v1696_v10 = vsel %vm1695_vm7, %v1691_v55, inf  ;;  %v1705_v55 = vcvt.s32.f32 %v1703_v20 }
 0x326   : > { %1697 = vmin.xlane.f32.xlu0 %v1696_v10 }
 0x327   : > { %v4009_v33 = vpop.xlane.xlu1 %1665  ;;  %v4023_v9 = vpop.xlane.xlu0 %1249 }
 0x328   : > { %vm1667_vm8 = vcmp.eq.f32.partialorder %v3621_v13, %v4009_v33  ;;  %4779 = vst [vmem:[#allocation111_spill] sm:$0xff] %v4023_v9 }
 0x329   : > { %v1668_v61 = vsel %vm1667_vm8, %v1663_v34, inf  ;;  %v1745_v34 = vand.u32 65535, %v3661_v26 }
 0x32a   : > { %1669 = vmin.xlane.f32.xlu0 %v1668_v61 }
 0x32b   : > { %v4016_v50 = vpop.xlane.xlu1 %1735 }
 0x32c   : > { %vm1737_vm9 = vcmp.eq.f32.partialorder %v3633_v19, %v4016_v50 }
 0x32d   : > { %v1738_v39 = vsel %vm1737_vm9, %v1733_v63, inf }
 0x32e   : > { %1739 = vmin.xlane.f32.xlu0 %v1738_v39  ;;  %v1747_v39 = vcvt.s32.f32 %v1745_v34  ;;  %v4781_v34 = vld [vmem:[#allocation68_spill] sm:$0xff] }
 0x32f   : > { %v1252_v43 = vpop.xlane.xlu1 %1251 }
 0x330   : > { %2871 = vlog2.f32 %v1252_v43  ;;  %v1717_v43 = vand.u32 65535, %v3677_v44 }
 0x333   : > { %v4025_v13 = vpop.xlane.xlu1 %1707 }
 0x334   : > { %vm1709_vm10 = vcmp.eq.f32.partialorder %v3654_v18, %v4025_v13 }
 0x335   : > { %v1710_v32 = vsel %vm1709_vm10, %v1705_v55, inf }
 0x336   : > { %1711 = vmin.xlane.f32.xlu0 %v1710_v32  ;;  %v4029_v10 = vpop.xlane.xlu0 %1805 }
 0x337   : > { %v1248_v19 = vpop.xlane.xlu1 %1247 }
 0x338   : > { %2873 = vlog2.f32 %v1248_v19  ;;  %v1719_v19 = vcvt.s32.f32 %v1717_v43 }
 0x33a   : > { %v2872_v58 = vpop.eup %2871  ;;  %v4032_v61 = vpop.xlane.xlu0 %1261 }
 0x33b   : > { %4780 = vst [vmem:[#allocation112_spill] sm:$0xff] %v4032_v61  ;;  %v1316_v8 = vmul.f32 0.6931472, %v2872_v58  ;;  %v4034_v63 = vpop.xlane.xlu1 %1749  ;;  %v1787_v58 = vand.u32 65535, %v3691_v27  ;;  %v4784_v27 = vld [vmem:[#allocation42_spill] sm:$0xff] }
 0x33c   : > { %vm1751_vm11 = vcmp.eq.f32.partialorder %v3687_v35, %v4034_v63  ;;  %v4782_v35 = vld [vmem:[#allocation6_spill] sm:$0xff] }
 0x33d   : > { %v1373_v18 = vadd.f32 %v1316_v8, %v3533_v21  ;;  %v1752_v20 = vsel %vm1751_vm11, %v1747_v39, inf }
 0x33e   : > { %1753 = vmin.xlane.f32.xlu0 %v1752_v20  ;;  %v1258_v55 = vpop.xlane.xlu0 %1257 }
 0x33f   : > { %v1501_v26 = vsub.f32 %v1373_v18, %v3547_v25  ;;  %v4041_v32 = vpop.xlane.xlu1 %1721  ;;  %2875 = vlog2.f32 %v1258_v55  ;;  %v1789_v18 = vcvt.s32.f32 %v1787_v58 }
 0x340   : > { %vm1723_vm12 = vcmp.eq.f32.partialorder %v4781_v34, %v4041_v32 }
 0x341   : > { %v1724_v44 = vsel %vm1723_vm12, %v1719_v19, inf  ;;  %v4050_v21 = vsel %vm2135_vm13, %v1501_v26, %v4782_v35  ;;  %v4785_v19 = vld [vmem:[#allocation44_spill] sm:$0xff]  ;;  %v1759_v26 = vand.u32 65535, %v3721_v5  ;;  %v4786_v35 = vld [vmem:[#allocation7_spill] sm:$0xff] }
 0x342   : > { %4783 = vst [vmem:[#allocation68_spill] sm:$0xff] %v4050_v21  ;;  %v2874_v8 = vpop.eup %2873  ;;  %1725 = vmin.xlane.f32.xlu0 %v1724_v44 }
 0x343   : > { %v1312_v25 = vmul.f32 0.6931472, %v2874_v8  ;;  %v4052_v39 = vpop.xlane.xlu1 %1791 }
 0x344   : > { %vm1793_vm14 = vcmp.eq.f32.partialorder %v3714_v57, %v4052_v39 }
 0x345   : > { %v1371_v43 = vadd.f32 %v1312_v25, %v4784_v27  ;;  %v1794_v20 = vsel %vm1793_vm14, %v1789_v18, inf  ;;  %v1761_v25 = vcvt.s32.f32 %v1759_v26  ;;  %v4788_v18 = vld [vmem:[#allocation60_spill] sm:$0xff]  ;;  %v1773_v26 = vand.u32 65535, %v3751_v12 }
 0x346   : > { %1795 = vmin.xlane.f32.xlu1 %v1794_v20  ;;  %v4057_v55 = vpop.xlane.xlu0 %1861  ;;  %v1801_v27 = vand.u32 65535, %v4788_v18  ;;  %v4789_v20 = vld [vmem:[#allocation55_spill] sm:$0xff] }
 0x347   : > { %v1499_v34 = vsub.f32 %v1371_v43, %v4785_v19  ;;  %v1260_v61 = vpop.xlane.xlu1 %1259 }
 0x348   : > { %2877 = vlog2.f32 %v1260_v61  ;;  %v4790_v61 = vld [vmem:[#allocation57_spill] sm:$0xff] }
 0x349   : > { %v2876_v44 = vpop.eup %2875  ;;  %v4064_v58 = vsel %vm2135_vm13, %v1499_v34, %v4786_v35  ;;  %v4791_v34 = vld [vmem:[#allocation63_spill] sm:$0xff]  ;;  %v1803_v35 = vcvt.s32.f32 %v1801_v27 }
 0x34a   : > { %4787 = vst [vmem:[#allocation6_spill] sm:$0xff] %v4064_v58  ;;  %v1322_v8 = vmul.f32 0.6931472, %v2876_v44  ;;  %v1270_v57 = vpop.xlane.xlu0 %1269  ;;  %vm1807_vm0 = vcmp.eq.f32.partialorder %v4791_v34, %v4029_v10  ;;  %v4794_v27 = vld [vmem:[#allocation71_spill] sm:$0xff]  ;;  %v4798_v58 = vld [vmem:[#allocation77_spill] sm:$0xff] }
 0x34b   : > { %v4066_v21 = vpop.xlane.xlu1 %1763  ;;  %2879 = vlog2.f32 %v1270_v57  ;;  %v4792_v57 = vld [vmem:[#allocation13_spill] sm:$0xff]  ;;  %v1857_v34 = vand.u32 65535, %v4794_v27  ;;  %v1829_v48 = vand.u32 65535, %v4798_v58 }
 0x34c   : > { %v1376_v43 = vadd.f32 %v1322_v8, %v4789_v20  ;;  %vm1765_vm15 = vcmp.eq.f32.partialorder %v3744_v0, %v4066_v21  ;;  %v1808_v0 = vsel %vm1807_vm0, %v1803_v35, inf  ;;  %v1843_v20 = vand.u32 65535, %v3765_v30  ;;  %v4796_v35 = vld [vmem:[#allocation74_spill] sm:$0xff] }
 0x34d   : > { %v1766_v5 = vsel %vm1765_vm15, %v1761_v25, inf  ;;  %vm1863_vm1 = vcmp.eq.f32.partialorder %v4796_v35, %v4057_v55  ;;  %v1859_v27 = vcvt.s32.f32 %v1857_v34  ;;  %v4804_v34 = vld [vmem:[#allocation87_spill] sm:$0xff] }
 0x34e   : > { %v1504_v19 = vsub.f32 %v1376_v43, %v4790_v61  ;;  %1767 = vmin.xlane.f32.xlu0 %v1766_v5  ;;  %v4073_v9 = vpop.xlane.xlu0 %1833  ;;  %v1775_v61 = vcvt.s32.f32 %v1773_v26  ;;  %v1845_v26 = vcvt.s32.f32 %v1843_v20  ;;  %v4803_v20 = vld [vmem:[#allocation80_spill] sm:$0xff] }
 0x34f   : > { %v1256_v44 = vpop.xlane.xlu1 %1255  ;;  %vm1835_vm4 = vcmp.eq.f32.partialorder %v4803_v20, %v4073_v9 }
 0x350   : > { %2881 = vlog2.f32 %v1256_v44  ;;  %v4081_v8 = vsel %vm2135_vm13, %v1504_v19, %v4792_v57  ;;  %v4795_v44 = vld [vmem:[#allocation46_spill] sm:$0xff] }
 0x351   : > { %4793 = vst [vmem:[#allocation42_spill] sm:$0xff] %v4081_v8 }
 0x352   : > { %v2878_v25 = vpop.eup %2877  ;;  %1809 = vmin.xlane.f32.xlu0 %v1808_v0  ;;  %v1266_v18 = vpop.xlane.xlu0 %1265 }
 0x353   : > { %v1324_v43 = vmul.f32 0.6931472, %v2878_v25  ;;  %v4084_v5 = vpop.xlane.xlu1 %1777  ;;  %2883 = vlog2.f32 %v1266_v18  ;;  %v4797_v25 = vld [vmem:[#allocation48_spill] sm:$0xff] }
 0x354   : > { %vm1779_vm2 = vcmp.eq.f32.partialorder %v3777_v36, %v4084_v5  ;;  %v4799_v36 = vld [vmem:[#allocation59_spill] sm:$0xff] }
 0x355   : > { %v2880_v12 = vpop.eup %2879  ;;  %v1377_v19 = vadd.f32 %v1324_v43, %v4795_v44  ;;  %v1780_v57 = vsel %vm1779_vm2, %v1775_v61, inf  ;;  %v1864_v61 = vsel %vm1863_vm1, %v1859_v27, inf  ;;  %v4800_v44 = vld [vmem:[#allocation10_spill] sm:$0xff]  ;;  %v4805_v27 = vld [vmem:[#allocation83_spill] sm:$0xff] }
 0x356   : > { %v1334_v0 = vmul.f32 0.6931472, %v2880_v12  ;;  %1781 = vmin.xlane.f32.xlu0 %v1780_v57  ;;  %v4092_v30 = vpop.xlane.xlu0 %1917 }
 0x357   : > { %v1505_v8 = vsub.f32 %v1377_v19, %v4797_v25  ;;  %v4095_v18 = vpop.xlane.xlu1 %1847  ;;  %v4802_v19 = vld [vmem:[#allocation62_spill] sm:$0xff] }
 0x358   : > { %v1382_v49 = vadd.f32 %v1334_v0, %v4799_v36  ;;  %vm1849_vm3 = vcmp.eq.f32.partialorder %v3793_v29, %v4095_v18  ;;  %v1815_v0 = vand.u32 65535, %v4804_v34  ;;  %v1913_v36 = vand.u32 65535, %v4805_v27 }
 0x359   : > { %v1850_v43 = vsel %vm1849_vm3, %v1845_v26, inf  ;;  %v4104_v12 = vsel %vm2135_vm13, %v1505_v8, %v4800_v44  ;;  %v1831_v26 = vcvt.s32.f32 %v1829_v48  ;;  %v4806_v8 = vld [vmem:[#allocation16_spill] sm:$0xff] }
 0x35a   : > { %4801 = vst [vmem:[#allocation44_spill] sm:$0xff] %v4104_v12  ;;  %v2882_v57 = vpop.eup %2881  ;;  %v1510_v35 = vsub.f32 %v1382_v49, %v4802_v19  ;;  %1851 = vmin.xlane.f32.xlu1 %v1850_v43  ;;  %1865 = vmin.xlane.f32.xlu0 %v1864_v61  ;;  %v1278_v58 = vpop.xlane.xlu0 %1277  ;;  %v4808_v19 = vld [vmem:[#allocation50_spill] sm:$0xff]  ;;  %v4810_v48 = vld [vmem:[#allocation52_spill] sm:$0xff]  ;;  %v1915_v27 = vcvt.s32.f32 %v1913_v36 }
 0x35b   : > { %v1320_v25 = vmul.f32 0.6931472, %v2882_v57  ;;  %v1268_v29 = vpop.xlane.xlu1 %1267  ;;  %2885 = vlog2.f32 %v1278_v58  ;;  %v1836_v43 = vsel %vm1835_vm4, %v1831_v26, inf  ;;  %v4809_v12 = vld [vmem:[#allocation86_spill] sm:$0xff] }
 0x35c   : > { %2887 = vlog2.f32 %v1268_v29  ;;  %v4114_v44 = vsel %vm2135_vm13, %v1510_v35, %v4806_v8  ;;  %vm1919_vm5 = vcmp.eq.f32.partialorder %v4809_v12, %v4092_v30  ;;  %v1817_v29 = vcvt.s32.f32 %v1815_v0  ;;  %v4812_v8 = vld [vmem:[#allocation65_spill] sm:$0xff] }
 0x35d   : > { %4807 = vst [vmem:[#allocation7_spill] sm:$0xff] %v4114_v44  ;;  %v2884_v49 = vpop.eup %2883  ;;  %v1375_v20 = vadd.f32 %v1320_v25, %v4808_v19  ;;  %v1885_v35 = vand.u32 65535, %v4811_v46  ;;  %v1920_v26 = vsel %vm1919_vm5, %v1915_v27, inf  ;;  %v4814_v19 = vld [vmem:[#allocation67_spill] sm:$0xff]  ;;  %v1969_v0 = vand.u32 65535, %v3840_v56 }
 0x35e   : > { %v1330_v61 = vmul.f32 0.6931472, %v2884_v49  ;;  %1837 = vmin.xlane.f32.xlu0 %v1836_v43  ;;  %v4119_v57 = vpop.xlane.xlu0 %1889  ;;  %v4813_v49 = vld [vmem:[#allocation11_spill] sm:$0xff]  ;;  %v4815_v43 = vld [vmem:[#allocation93_spill] sm:$0xff] }
 0x35f   : > { %v1503_v58 = vsub.f32 %v1375_v20, %v4810_v48  ;;  %v4122_v34 = vpop.xlane.xlu1 %1819  ;;  %vm1891_vm7 = vcmp.eq.f32.partialorder %v3819_v54, %v4119_v57  ;;  %v4816_v48 = vld [vmem:[#allocation17_spill] sm:$0xff] }
 0x360   : > { %v1380_v44 = vadd.f32 %v1330_v61, %v4812_v8  ;;  %vm1821_vm6 = vcmp.eq.f32.partialorder %v3821_v31, %v4122_v34  ;;  %v1887_v31 = vcvt.s32.f32 %v1885_v35  ;;  %v1899_v61 = vand.u32 65535, %v4815_v43 }
 0x361   : > { %v1822_v25 = vsel %vm1821_vm6, %v1817_v29, inf  ;;  %v4131_v12 = vsel %vm2135_vm13, %v1503_v58, %v4813_v49  ;;  %v4818_v49 = vld [vmem:[#allocation70_spill] sm:$0xff] }
 0x362   : > { %v1508_v20 = vsub.f32 %v1380_v44, %v4814_v19  ;;  %1823 = vmin.xlane.f32.xlu1 %v1822_v25  ;;  %1921 = vmin.xlane.f32.xlu0 %v1920_v26  ;;  %v1274_v46 = vpop.xlane.xlu0 %1273  ;;  %v1892_v29 = vsel %vm1891_vm7, %v1887_v31, inf  ;;  %v1971_v25 = vcvt.s32.f32 %v1969_v0  ;;  %v1901_v35 = vcvt.s32.f32 %v1899_v61  ;;  %v4823_v61 = vld [vmem:[#allocation98_spill] sm:$0xff] }
 0x363   : > { %v1264_v36 = vpop.xlane.xlu1 %1263  ;;  %2889 = vlog2.f32 %v1274_v46 }
 0x364   : > { %2891 = vlog2.f32 %v1264_v36  ;;  %v4141_v58 = vsel %vm2135_vm13, %v1508_v20, %v4816_v48  ;;  %v4819_v20 = vld [vmem:[#allocation97_spill] sm:$0xff]  ;;  %v4820_v36 = vld [vmem:[#allocation54_spill] sm:$0xff] }
 0x365   : > { %4817 = vst [vmem:[#allocation60_spill] sm:$0xff] %v4141_v58  ;;  %v2886_v44 = vpop.eup %2885  ;;  %v4821_v48 = vld [vmem:[#allocation73_spill] sm:$0xff] }
 0x366   : > { %v2888_v27 = vpop.eup %2887  ;;  %v1342_v54 = vmul.f32 0.6931472, %v2886_v44  ;;  %1893 = vmin.xlane.f32.xlu0 %v1892_v29  ;;  %v4143_v8 = vpop.xlane.xlu0 %1973  ;;  %v1941_v29 = vand.u32 65535, %v3868_v1 }
 0x367   : > { %v1332_v56 = vmul.f32 0.6931472, %v2888_v27  ;;  %v4145_v26 = vpop.xlane.xlu1 %1903  ;;  %vm1975_vm8 = vcmp.eq.f32.partialorder %v3849_v62, %v4143_v8  ;;  %v4822_v27 = vld [vmem:[#allocation56_spill] sm:$0xff] }
 0x368   : > { %v1386_v19 = vadd.f32 %v1342_v54, %v4818_v49  ;;  %vm1905_vm9 = vcmp.eq.f32.partialorder %v4819_v20, %v4145_v26  ;;  %v1976_v46 = vsel %vm1975_vm8, %v1971_v25, inf  ;;  %v1871_v54 = vand.u32 65535, %v4823_v61  ;;  %v4824_v49 = vld [vmem:[#allocation20_spill] sm:$0xff] }
 0x369   : > { %v1381_v31 = vadd.f32 %v1332_v56, %v4820_v36  ;;  %v1906_v43 = vsel %vm1905_vm9, %v1901_v35, inf  ;;  %v4826_v35 = vld [vmem:[#allocation14_spill] sm:$0xff]  ;;  %v1943_v36 = vcvt.s32.f32 %v1941_v29 }
 0x36a   : > { %v1514_v44 = vsub.f32 %v1386_v19, %v4821_v48  ;;  %1907 = vmin.xlane.f32.xlu1 %v1906_v43  ;;  %1977 = vmin.xlane.f32.xlu0 %v1976_v46  ;;  %v1286_v0 = vpop.xlane.xlu0 %1285  ;;  %v1873_v48 = vcvt.s32.f32 %v1871_v54 }
 0x36b   : > { %v1509_v58 = vsub.f32 %v1381_v31, %v4822_v27  ;;  %v1276_v62 = vpop.xlane.xlu1 %1275  ;;  %2893 = vlog2.f32 %v1286_v0  ;;  %v4829_v27 = vld [vmem:[#allocation102_spill] sm:$0xff] }
 0x36c   : > { %2895 = vlog2.f32 %v1276_v62  ;;  %v4160_v25 = vsel %vm2135_vm13, %v1514_v44, %v4824_v49  ;;  %v4828_v44 = vld [vmem:[#allocation76_spill] sm:$0xff] }
 0x36d   : > { %4825 = vst [vmem:[#allocation55_spill] sm:$0xff] %v4160_v25  ;;  %v2890_v56 = vpop.eup %2889  ;;  %v4165_v19 = vsel %vm2135_vm13, %v1509_v58, %v4826_v35  ;;  %v4830_v58 = vld [vmem:[#allocation58_spill] sm:$0xff] }
 0x36e   : > { %4827 = vst [vmem:[#allocation57_spill] sm:$0xff] %v4165_v19  ;;  %v2892_v20 = vpop.eup %2891  ;;  %v1338_v1 = vmul.f32 0.6931472, %v2890_v56  ;;  %v4167_v46 = vpop.xlane.xlu0 %1945  ;;  %v4831_v56 = vld [vmem:[#allocation79_spill] sm:$0xff] }
 0x36f   : > { %v1328_v31 = vmul.f32 0.6931472, %v2892_v20  ;;  %v4169_v43 = vpop.xlane.xlu1 %1875  ;;  %vm1947_vm10 = vcmp.eq.f32.partialorder %v3877_v40, %v4167_v46  ;;  %v4832_v20 = vld [vmem:[#allocation61_spill] sm:$0xff]  ;;  %v4833_v40 = vld [vmem:[#allocation103_spill] sm:$0xff] }
 0x370   : > { %v1384_v0 = vadd.f32 %v1338_v1, %v4828_v44  ;;  %vm1877_vm11 = vcmp.eq.f32.partialorder %v4829_v27, %v4169_v43  ;;  %v1948_v62 = vsel %vm1947_vm10, %v1943_v36, inf  ;;  %v1955_v54 = vand.u32 65535, %v4833_v40  ;;  %v4834_v1 = vld [vmem:[#allocation21_spill] sm:$0xff] }
 0x371   : > { %v1379_v61 = vadd.f32 %v1328_v31, %v4830_v58  ;;  %v1878_v49 = vsel %vm1877_vm11, %v1873_v48, inf  ;;  %1949 = vmin.xlane.f32.xlu0 %v1948_v62  ;;  %v4836_v31 = vld [vmem:[#allocation15_spill] sm:$0xff]  ;;  %v4839_v40 = vld [vmem:[#allocation85_spill] sm:$0xff] }
 0x372   : > { %v1512_v35 = vsub.f32 %v1384_v0, %v4831_v56  ;;  %1879 = vmin.xlane.f32.xlu1 %v1878_v49  ;;  %v1282_v29 = vpop.xlane.xlu0 %1281  ;;  %v1957_v49 = vcvt.s32.f32 %v1955_v54  ;;  %v1927_v54 = vand.u32 65535, %v3917_v37 }
 0x373   : > { %v1507_v25 = vsub.f32 %v1379_v61, %v4832_v20  ;;  %v1272_v19 = vpop.xlane.xlu1 %1271  ;;  %2897 = vlog2.f32 %v1282_v29 }
 0x374   : > { %2899 = vlog2.f32 %v1272_v19  ;;  %v4183_v44 = vsel %vm2135_vm13, %v1512_v35, %v4834_v1  ;;  %v4837_v19 = vld [vmem:[#allocation82_spill] sm:$0xff]  ;;  %v4838_v35 = vld [vmem:[#allocation64_spill] sm:$0xff] }
 0x375   : > { %4835 = vst [vmem:[#allocation63_spill] sm:$0xff] %v4183_v44  ;;  %v2894_v36 = vpop.eup %2893  ;;  %v4188_v48 = vsel %vm2135_vm13, %v1507_v25, %v4836_v31  ;;  %v4840_v31 = vld [vmem:[#allocation66_spill] sm:$0xff] }
 0x376   : > { %v2896_v0 = vpop.eup %2895  ;;  %v1350_v27 = vmul.f32 0.6931472, %v2894_v36  ;;  %v4190_v62 = vpop.xlane.xlu0 %2029  ;;  %v1997_v36 = vand.u32 65535, %v3928_v59 }
 0x377   : > { %v1340_v58 = vmul.f32 0.6931472, %v2896_v0  ;;  %v4192_v61 = vpop.xlane.xlu1 %1959  ;;  %vm2031_vm0 = vcmp.eq.f32.partialorder %v3909_v17, %v4190_v62  ;;  %v4850_v17 = vld [vmem:[#allocation19_spill] sm:$0xff] }
 0x378   : > { %v1390_v56 = vadd.f32 %v1350_v27, %v4837_v19  ;;  %vm1961_vm12 = vcmp.eq.f32.partialorder %v3911_v60, %v4192_v61  ;;  %v4841_v27 = vld [vmem:[#allocation24_spill] sm:$0xff] }
 0x379   : > { %v1385_v29 = vadd.f32 %v1340_v58, %v4838_v35  ;;  %v1962_v20 = vsel %vm1961_vm12, %v1957_v49, inf  ;;  %v4843_v49 = vld [vmem:[#allocation18_spill] sm:$0xff] }
 0x37a   : > { %v1518_v1 = vsub.f32 %v1390_v56, %v4839_v40  ;;  %1963 = vmin.xlane.f32.xlu1 %v1962_v20  ;;  %v1294_v25 = vpop.xlane.xlu0 %1293  ;;  %v2025_v20 = vand.u32 65535, %v3898_v38  ;;  %v4846_v38 = vld [vmem:[#allocation91_spill] sm:$0xff] }
 0x37b   : > { %v1513_v44 = vsub.f32 %v1385_v29, %v4840_v31  ;;  %v1284_v0 = vpop.xlane.xlu1 %1283  ;;  %2901 = vlog2.f32 %v1294_v25  ;;  %v1999_v29 = vcvt.s32.f32 %v1997_v36  ;;  %v4844_v25 = vld [vmem:[#allocation88_spill] sm:$0xff] }
 0x37c   : > { %2903 = vlog2.f32 %v1284_v0  ;;  %v4205_v60 = vsel %vm2135_vm13, %v1518_v1, %v4841_v27  ;;  %v1929_v1 = vcvt.s32.f32 %v1927_v54  ;;  %v4845_v0 = vld [vmem:[#allocation69_spill] sm:$0xff] }
 0x37d   : > { %4842 = vst [vmem:[#allocation13_spill] sm:$0xff] %v4205_v60  ;;  %v2898_v58 = vpop.eup %2897  ;;  %v4210_v19 = vsel %vm2135_vm13, %v1513_v44, %v4843_v49 }
 0x37e   : > { %v2900_v56 = vpop.eup %2899  ;;  %v1346_v59 = vmul.f32 0.6931472, %v2898_v58  ;;  %v4212_v35 = vpop.xlane.xlu0 %2001 }
 0x37f   : > { %v1336_v37 = vmul.f32 0.6931472, %v2900_v56  ;;  %v4215_v40 = vpop.xlane.xlu1 %1931  ;;  %vm2003_vm14 = vcmp.eq.f32.partialorder %v3933_v28, %v4212_v35  ;;  %v2027_v56 = vcvt.s32.f32 %v2025_v20  ;;  %v4847_v28 = vld [vmem:[#allocation72_spill] sm:$0xff] }
 0x380   : > { %v1388_v31 = vadd.f32 %v1346_v59, %v4844_v25  ;;  %vm1933_vm15 = vcmp.eq.f32.partialorder %v3935_v42, %v4215_v40  ;;  %v2004_v44 = vsel %vm2003_vm14, %v1999_v29, inf  ;;  %v4848_v42 = vld [vmem:[#allocation25_spill] sm:$0xff] }
 0x381   : > { %v1383_v27 = vadd.f32 %v1336_v37, %v4845_v0  ;;  %v1934_v36 = vsel %vm1933_vm15, %v1929_v1, inf  ;;  %2005 = vmin.xlane.f32.xlu0 %v2004_v44  ;;  %v2032_v59 = vsel %vm2031_vm0, %v2027_v56, inf }
 0x382   : > { %v1516_v58 = vsub.f32 %v1388_v31, %v4846_v38  ;;  %1935 = vmin.xlane.f32.xlu1 %v1934_v36  ;;  %v1290_v49 = vpop.xlane.xlu0 %1289  ;;  %v4852_v38 = vld [vmem:[#allocation75_spill] sm:$0xff] }
 0x383   : > { %v1511_v54 = vsub.f32 %v1383_v27, %v4847_v28  ;;  %v1280_v60 = vpop.xlane.xlu1 %1279  ;;  %2905 = vlog2.f32 %v1290_v49  ;;  %v4851_v27 = vld [vmem:[#allocation94_spill] sm:$0xff]  ;;  %v4853_v49 = vld [vmem:[#allocation95_spill] sm:$0xff] }
 0x384   : > { %2907 = vlog2.f32 %v1280_v60  ;;  %v4230_v29 = vsel %vm2135_vm13, %v1516_v58, %v4848_v42  ;;  %v1983_v60 = vand.u32 65535, %v3944_v22  ;;  %v4855_v22 = vld [vmem:[#allocation28_spill] sm:$0xff] }
 0x385   : > { %4849 = vst [vmem:[#allocation71_spill] sm:$0xff] %v4230_v29  ;;  %v2902_v37 = vpop.eup %2901  ;;  %2033 = vmin.xlane.f32.xlu0 %v2032_v59  ;;  %v4235_v1 = vsel %vm2135_vm13, %v1511_v54, %v4850_v17  ;;  %v4854_v59 = vld [vmem:[#allocation78_spill] sm:$0xff]  ;;  %v2011_v17 = vand.u32 65535, %v3952_v24 }
 0x386   : > { %v2904_v25 = vpop.eup %2903  ;;  %v1358_v20 = vmul.f32 0.6931472, %v2902_v37  ;;  %v1302_v31 = vpop.xlane.xlu0 %1301  ;;  %v1985_v37 = vcvt.s32.f32 %v1983_v60 }
 0x387   : > { %v1348_v44 = vmul.f32 0.6931472, %v2904_v25  ;;  %v1292_v0 = vpop.xlane.xlu1 %1291  ;;  %2909 = vlog2.f32 %v1302_v31 }
 0x388   : > { %v1394_v36 = vadd.f32 %v1358_v20, %v4851_v27  ;;  %2911 = vlog2.f32 %v1292_v0 }
 0x389   : > { %v1389_v58 = vadd.f32 %v1348_v44, %v4852_v38  ;;  %v4857_v44 = vld [vmem:[#allocation22_spill] sm:$0xff]  ;;  %v2013_v38 = vcvt.s32.f32 %v2011_v17  ;;  %v1630_v17 = vcvt.f32.s32 %v3966_v41 }
 0x38a   : > { %v1522_v56 = vsub.f32 %v1394_v36, %v4853_v49  ;;  %v1298_v28 = vpop.xlane.xlu0 %1297 }
 0x38b   : > { %v1517_v42 = vsub.f32 %v1389_v58, %v4854_v59  ;;  %v4242_v54 = vpop.xlane.xlu1 %1987  ;;  %2913 = vlog2.f32 %v1298_v28 }
 0x38c   : > { %vm1989_vm2 = vcmp.eq.f32.partialorder %v3956_v15, %v4242_v54  ;;  %v4250_v25 = vsel %vm2135_vm13, %v1522_v56, %v4855_v22  ;;  %v4858_v15 = vld [vmem:[#allocation99_spill] sm:$0xff]  ;;  %v4859_v56 = vld [vmem:[#allocation81_spill] sm:$0xff] }
 0x38d   : > { %4856 = vst [vmem:[#allocation46_spill] sm:$0xff] %v4250_v25  ;;  %v2906_v20 = vpop.eup %2905  ;;  %v1990_v31 = vsel %vm1989_vm2, %v1985_v37, inf  ;;  %v4255_v0 = vsel %vm2135_vm13, %v1517_v42, %v4857_v44  ;;  %v4860_v22 = vld [vmem:[#allocation101_spill] sm:$0xff] }
 0x38e   : > { %v2908_v27 = vpop.eup %2907  ;;  %v1354_v36 = vmul.f32 0.6931472, %v2906_v20  ;;  %1991 = vmin.xlane.f32.xlu1 %v1990_v31  ;;  %v4861_v31 = vld [vmem:[#allocation84_spill] sm:$0xff] }
 0x38f   : > { %v1344_v60 = vmul.f32 0.6931472, %v2908_v27  ;;  %v4257_v24 = vpop.xlane.xlu1 %2015 }
 0x390   : > { %v1392_v58 = vadd.f32 %v1354_v36, %v4858_v15  ;;  %vm2017_vm1 = vcmp.eq.f32.partialorder %v3963_v51, %v4257_v24  ;;  %v4862_v51 = vld [vmem:[#allocation29_spill] sm:$0xff] }
 0x391   : > { %v2910_v49 = vpop.eup %2909  ;;  %v1387_v28 = vadd.f32 %v1344_v60, %v4859_v56  ;;  %v2018_v59 = vsel %vm2017_vm1, %v2013_v38, inf  ;;  %v4864_v15 = vld [vmem:[#allocation89_spill] sm:$0xff] }
 0x392   : > { %v2912_v37 = vpop.eup %2911  ;;  %v1520_v42 = vsub.f32 %v1392_v58, %v4860_v22  ;;  %v1366_v44 = vmul.f32 0.6931472, %v2910_v49  ;;  %2019 = vmin.xlane.f32.xlu1 %v2018_v59  ;;  %v1628_v20 = vpop.xlane.xlu0 %1627  ;;  %v4865_v49 = vld [vmem:[#allocation23_spill] sm:$0xff]  ;;  %v4867_v22 = vld [vmem:[#allocation92_spill] sm:$0xff] }
 0x393   : > { %v1515_v27 = vsub.f32 %v1387_v28, %v4861_v31  ;;  %v1356_v25 = vmul.f32 0.6931472, %v2912_v37  ;;  %v1288_v29 = vpop.xlane.xlu1 %1287  ;;  %v4866_v28 = vld [vmem:[#allocation105_spill] sm:$0xff]  ;;  %v1629_v41 = vcvt.f32.s32 %v1628_v20 }
 0x394   : > { %v1398_v36 = vadd.f32 %v1366_v44, %v3888_v23  ;;  %2915 = vlog2.f32 %v1288_v29  ;;  %v4270_v60 = vsel %vm2135_vm13, %v1520_v42, %v4862_v51  ;;  %v1602_v23 = vcvt.f32.s32 %v3971_v3 }
 0x395   : > { %4863 = vst [vmem:[#allocation74_spill] sm:$0xff] %v4270_v60  ;;  %v2914_v38 = vpop.eup %2913  ;;  %v1393_v58 = vadd.f32 %v1356_v25, %v4864_v15  ;;  %v4276_v56 = vsel %vm2135_vm13, %v1515_v27, %v4865_v49  ;;  %v1644_v29 = vcvt.f32.s32 %v3976_v47  ;;  %v1631_v51 = vshll.u32 %v1630_v17, 16  ;;  %v4868_v60 = vld [vmem:[#allocation107_spill] sm:$0xff]  ;;  %v4869_v15 = vld [vmem:[#allocation26_spill] sm:$0xff] }
 0x396   : > { %v1526_v59 = vsub.f32 %v1398_v36, %v4866_v28  ;;  %v1362_v37 = vmul.f32 0.6931472, %v2914_v38  ;;  %v1600_v31 = vpop.xlane.xlu0 %1599  ;;  %v4870_v36 = vld [vmem:[#allocation32_spill] sm:$0xff]  ;;  %v1616_v28 = vcvt.f32.s32 %v3981_v16 }
 0x397   : > { %v1521_v44 = vsub.f32 %v1393_v58, %v4867_v22  ;;  %v1300_v42 = vpop.xlane.xlu1 %1299  ;;  %v1632_v20 = vadd.s32 %v1631_v51, %v1629_v41  ;;  %v1601_v38 = vcvt.f32.s32 %v1600_v31  ;;  %v1603_v58 = vshll.u32 %v1602_v23, 16  ;;  %v4871_v22 = vld [vmem:[#allocation33_spill] sm:$0xff] }
 0x398   : > { %v1396_v25 = vadd.f32 %v1362_v37, %v4868_v60  ;;  %2917 = vlog2.f32 %v1300_v42  ;;  %v4291_v3 = vsel %vm2135_vm13, %v1526_v59, %v4870_v36  ;;  %v1645_v17 = vshll.u32 %v1644_v29, 16  ;;  %v2935_v42 = vld [vmem:[%s3093_s13 + $0x10] sm:$0xff]  ;;  %v2936_v51 = vld [vmem:[%s3093_s13 + $0x18] sm:$0xff] }
 0x399   : > { %v4286_v27 = vsel %vm2135_vm13, %v1521_v44, %v4869_v15  ;;  %vm2041_vm3 = vcmp.eq.s32.totalorder %v1632_v20, %v2935_v42  ;;  %v1617_v29 = vshll.u32 %v1616_v28, 16  ;;  %v2976_v36 = vmov 0.0   ;;  %v4874_v28 = vld [vmem:[#allocation104_spill] sm:$0xff] }
 0x39a   : > { %v1524_v47 = vsub.f32 %v1396_v25, %v4000_v45  ;;  %v1604_v45 = vadd.s32 %v1603_v58, %v1601_v38  ;;  %v4872_v25 = vld [vmem:[#allocation96_spill] sm:$0xff] }
 0x39b   : > { %v1296_v60 = vpop.xlane.xlu1 %1295  ;;  %v1642_v49 = vpop.xlane.xlu0 %1641  ;;  %v4873_v58 = vld [vmem:[#allocation100_spill] sm:$0xff] }
 0x39c   : > { %2919 = vlog2.f32 %v1296_v60  ;;  %v1643_v37 = vcvt.f32.s32 %v1642_v49  ;;  %v4298_v44 = vsel %vm2135_vm13, %v1524_v47, %v4871_v22  ;;  %v2507_v60 = vsel %vm2041_vm3, 1.0, %v2976_v36  ;;  %v2937_v22 = vld [vmem:[%s3093_s13] sm:$0xff] }
 0x39d   : > { %vm2039_vm5 = vcmp.eq.s32.totalorder %v1604_v45, %v2937_v22  ;;  %2921 = vlog2.f32 %v4005_v4 }
 0x39e   : > { %v2916_v59 = vpop.eup %2915  ;;  %v1646_v41 = vadd.s32 %v1645_v17, %v1643_v37  ;;  %2923 = vlog2.f32 %v3990_v6 }
 0x39f   : > { %v1352_v23 = vmul.f32 0.6931472, %v2916_v59  ;;  %v1614_v31 = vpop.xlane.xlu0 %1613  ;;  %v2938_v59 = vld [vmem:[%s3093_s13 + $0x8] sm:$0xff] }
 0x3a0   : > { %vm2042_vm4 = vcmp.eq.s32.totalorder %v1646_v41, %v2936_v51  ;;  %v1615_v16 = vcvt.f32.s32 %v1614_v31  ;;  %v2505_v41 = vsel %vm2039_vm5, 1.0, %v2976_v36  ;;  %v4875_v31 = vld [vmem:[#allocation27_spill] sm:$0xff] }
 0x3a1   : > { %v1391_v15 = vadd.f32 %v1352_v23, %v4872_v25  ;;  %v2508_v47 = vsel %vm2042_vm4, 1.0, %v2976_v36 }
 0x3a2   : > { %v2918_v49 = vpop.eup %2917  ;;  %v2695_v20 = vpack.i.bf16 %v2508_v47, %v2507_v60  ;;  %v1618_v38 = vadd.s32 %v1617_v29, %v1615_v16  ;;  %v4876_v29 = vld [vmem:[#allocation106_spill] sm:$0xff] }
 0x3a3   : > { %v1519_v17 = vsub.f32 %v1391_v15, %v4873_v58  ;;  %v1364_v37 = vmul.f32 0.6931472, %v2918_v49  ;;  %v4877_v47 = vld [vmem:[#allocation30_spill] sm:$0xff]  ;;  %v4878_v58 = vld [vmem:[#allocation31_spill] sm:$0xff] }
 0x3a4   : > { %vm2040_vm6 = vcmp.eq.s32.totalorder %v1618_v38, %v2938_v59  ;;  %2696 = vperm.xlu0 %2693, %v2695_v20   ;;  %v1684_v20 = vpop.xlane.xlu0 %1683  ;;  %v1686_v38 = vcvt.f32.s32 %v3986_v7  ;;  %v1672_v7 = vcvt.f32.s32 %v4009_v33  ;;  %v2942_v33 = vld [vmem:[%s3093_s13 + $0x28] sm:$0xff] }
 0x3a5   : > { %v1397_v42 = vadd.f32 %v1364_v37, %v4874_v28  ;;  %v2506_v23 = vsel %vm2040_vm6, 1.0, %v2976_v36  ;;  %v4314_v51 = vsel %vm2135_vm13, %v1519_v17, %v4875_v31  ;;  %v1685_v37 = vcvt.f32.s32 %v1684_v20 }
 0x3a6   : > { %v2920_v45 = vpop.eup %2919  ;;  %v2700_v25 = vpack.i.bf16 %v2506_v23, %v2505_v41  ;;  %v1687_v28 = vshll.u32 %v1686_v38, 16  ;;  %v2941_v38 = vld [vmem:[%s3093_s13 + $0x20] sm:$0xff] }
 0x3a7   : > { %v1525_v16 = vsub.f32 %v1397_v42, %v4876_v29  ;;  %v1360_v15 = vmul.f32 0.6931472, %v2920_v45  ;;  %v1700_v42 = vcvt.f32.s32 %v4002_v2  ;;  %v2939_v29 = vld [vmem:[%s3093_s13 + $0x30] sm:$0xff] }
 0x3a8   : > { %2701 = vperm.xlu1 %2694, %v2700_v25   ;;  %v1688_v41 = vadd.s32 %v1687_v28, %v1685_v37 }
 0x3a9   : > { %v1395_v60 = vadd.f32 %v1360_v15, %v3931_v53  ;;  %v4321_v49 = vsel %vm2135_vm13, %v1525_v16, %v4877_v47  ;;  %v1658_v53 = vcvt.f32.s32 %v3993_v14  ;;  %v1701_v45 = vshll.u32 %v1700_v42, 16 }
 0x3aa   : > { %vm2045_vm7 = vcmp.eq.s32.totalorder %v1688_v41, %v2939_v29  ;;  %v1673_v47 = vshll.u32 %v1672_v7, 16  ;;  %v1742_v41 = vcvt.f32.s32 %v4016_v50  ;;  %v1756_v7 = vcvt.f32.s32 %v4034_v63 }
 0x3ab   : > { %v1523_v22 = vsub.f32 %v1395_v60, %v3960_v11  ;;  %v1656_v59 = vpop.xlane.xlu0 %1655  ;;  %v1659_v31 = vshll.u32 %v1658_v53, 16  ;;  %v2511_v2 = vsel %vm2045_vm7, 1.0, %v2976_v36 }
 0x3ac   : > { %v1657_v23 = vcvt.f32.s32 %v1656_v59 }
 0x3ad   : > { %v4328_v17 = vsel %vm2135_vm13, %v1523_v22, %v4878_v58  ;;  %v2940_v22 = vld [vmem:[%s3093_s13 + $0x38] sm:$0xff] }
 0x3ae   : > { %v1660_v16 = vadd.s32 %v1659_v31, %v1657_v23  ;;  %v1743_v31 = vshll.u32 %v1742_v41, 16 }
 0x3b0   : > { %vm2043_vm9 = vcmp.eq.s32.totalorder %v1660_v16, %v2941_v38 }
 0x3b1   : > { %v2509_v59 = vsel %vm2043_vm9, 1.0, %v2976_v36 }
 0x3b3   : > { %v1698_v11 = vpop.xlane.xlu0 %1697 }
 0x3b4   : > { %v1699_v25 = vcvt.f32.s32 %v1698_v11 }
 0x3b6   : > { %v1702_v15 = vadd.s32 %v1701_v45, %v1699_v25  ;;  %v1714_v45 = vcvt.f32.s32 %v4025_v13 }
 0x3b7   : > { %v1670_v60 = vpop.xlane.xlu0 %1669 }
 0x3b8   : > { %vm2046_vm8 = vcmp.eq.s32.totalorder %v1702_v15, %v2940_v22  ;;  %v1671_v14 = vcvt.f32.s32 %v1670_v60  ;;  %v1715_v15 = vshll.u32 %v1714_v45, 16  ;;  %v1757_v60 = vshll.u32 %v1756_v7, 16 }
 0x3b9   : > { %v2512_v20 = vsel %vm2046_vm8, 1.0, %v2976_v36  ;;  %v1812_v7 = vcvt.f32.s32 %v4029_v10 }
 0x3ba   : > { %v2705_v58 = vpack.i.bf16 %v2512_v20, %v2511_v2  ;;  %v1674_v37 = vadd.s32 %v1673_v47, %v1671_v14  ;;  %v1728_v47 = vcvt.f32.s32 %v4041_v32  ;;  %v2943_v14 = vld [vmem:[%s3093_s13 + $0x50] sm:$0xff]  ;;  %v2946_v32 = vld [vmem:[%s3093_s13 + $0x48] sm:$0xff] }
 0x3bb   : > { %v1740_v42 = vpop.xlane.xlu0 %1739 }
 0x3bc   : > { %vm2044_vm10 = vcmp.eq.s32.totalorder %v1674_v37, %v2942_v33  ;;  %2706 = vperm.xlu1 %2694, %v2705_v58   ;;  %v1741_v23 = vcvt.f32.s32 %v1740_v42  ;;  %v1729_v38 = vshll.u32 %v1728_v47, 16  ;;  %v2944_v58 = vld [vmem:[%s3093_s13 + $0x58] sm:$0xff]  ;;  %v2945_v33 = vld [vmem:[%s3093_s13 + $0x40] sm:$0xff]  ;;  %v1813_v47 = vshll.u32 %v1812_v7, 16 }
 0x3bd   : > { %v2510_v28 = vsel %vm2044_vm10, 1.0, %v2976_v36 }
 0x3be   : > { %v2710_v53 = vpack.i.bf16 %v2510_v28, %v2509_v59  ;;  %v1744_v25 = vadd.s32 %v1743_v31, %v1741_v23 }
 0x3c0   : > { %2711 = vperm.xlu1 %2694, %v2710_v53   ;;  %vm2049_vm11 = vcmp.eq.s32.totalorder %v1744_v25, %v2943_v14  ;;  %v1784_v14 = vcvt.f32.s32 %v4084_v5  ;;  %v2949_v5 = vld [vmem:[%s3093_s13 + $0x60] sm:$0xff] }
 0x3c1   : > { %v2515_v63 = vsel %vm2049_vm11, 1.0, %v2976_v36 }
 0x3c3   : > { %v1712_v11 = vpop.xlane.xlu0 %1711 }
 0x3c4   : > { %v1713_v29 = vcvt.f32.s32 %v1712_v11  ;;  %v1798_v11 = vcvt.f32.s32 %v4052_v39 }
 0x3c6   : > { %v1716_v50 = vadd.s32 %v1715_v15, %v1713_v29  ;;  %v1799_v25 = vshll.u32 %v1798_v11, 16  ;;  %v1770_v29 = vcvt.f32.s32 %v4066_v21  ;;  %v1854_v21 = vcvt.f32.s32 %v4095_v18  ;;  %v2950_v18 = vld [vmem:[%s3093_s13 + $0x68] sm:$0xff] }
 0x3c8   : > { %vm2047_vm14 = vcmp.eq.s32.totalorder %v1716_v50, %v2945_v33 }
 0x3c9   : > { %v2513_v53 = vsel %vm2047_vm14, 1.0, %v2976_v36 }
 0x3cb   : > { %v1754_v16 = vpop.xlane.xlu0 %1753 }
 0x3cc   : > { %v1755_v22 = vcvt.f32.s32 %v1754_v16 }
 0x3ce   : > { %v1758_v2 = vadd.s32 %v1757_v60, %v1755_v22  ;;  %v1771_v22 = vshll.u32 %v1770_v29, 16 }
 0x3cf   : > { %v1726_v20 = vpop.xlane.xlu0 %1725 }
 0x3d0   : > { %vm2050_vm12 = vcmp.eq.s32.totalorder %v1758_v2, %v2944_v58  ;;  %v1727_v13 = vcvt.f32.s32 %v1726_v20  ;;  %v2947_v2 = vld [vmem:[%s3093_s13 + $0x70] sm:$0xff]  ;;  %v1785_v58 = vshll.u32 %v1784_v14, 16 }
 0x3d1   : > { %v2516_v37 = vsel %vm2050_vm12, 1.0, %v2976_v36 }
 0x3d2   : > { %v2715_v59 = vpack.i.bf16 %v2516_v37, %v2515_v63  ;;  %v1730_v28 = vadd.s32 %v1729_v38, %v1727_v13  ;;  %v1868_v38 = vcvt.f32.s32 %v4057_v55  ;;  %v2948_v13 = vld [vmem:[%s3093_s13 + $0x78] sm:$0xff] }
 0x3d3   : > { %v1796_v23 = vpop.xlane.xlu1 %1795 }
 0x3d4   : > { %vm2048_vm15 = vcmp.eq.s32.totalorder %v1730_v28, %v2946_v32  ;;  %2716 = vperm.xlu1 %2694, %v2715_v59   ;;  %v1797_v31 = vcvt.f32.s32 %v1796_v23  ;;  %v1869_v32 = vshll.u32 %v1868_v38, 16 }
 0x3d5   : > { %v2514_v42 = vsel %vm2048_vm15, 1.0, %v2976_v36 }
 0x3d6   : > { %v2720_v41 = vpack.i.bf16 %v2514_v42, %v2513_v53  ;;  %v1800_v16 = vadd.s32 %v1799_v25, %v1797_v31  ;;  %v1840_v53 = vcvt.f32.s32 %v4073_v9  ;;  %v1826_v9 = vcvt.f32.s32 %v4122_v34 }
 0x3d8   : > { %2721 = vperm.xlu0 %2693, %v2720_v41   ;;  %vm2053_vm0 = vcmp.eq.s32.totalorder %v1800_v16, %v2947_v2  ;;  %v1855_v41 = vshll.u32 %v1854_v21, 16  ;;  %v1841_v16 = vshll.u32 %v1840_v53, 16  ;;  %v2953_v21 = vld [vmem:[%s3093_s13 + $0x88] sm:$0xff] }
 0x3d9   : > { %v2519_v37 = vsel %vm2053_vm0, 1.0, %v2976_v36 }
 0x3db   : > { %v1768_v45 = vpop.xlane.xlu0 %1767 }
 0x3dc   : > { %v1769_v15 = vcvt.f32.s32 %v1768_v45 }
 0x3de   : > { %v1772_v39 = vadd.s32 %v1771_v22, %v1769_v15 }
 0x3df   : > { %v1810_v60 = vpop.xlane.xlu0 %1809 }
 0x3e0   : > { %v1811_v50 = vcvt.f32.s32 %v1810_v60  ;;  %vm2051_vm1 = vcmp.eq.s32.totalorder %v1772_v39, %v2949_v5  ;;  %v2951_v60 = vld [vmem:[%s3093_s13 + $0x90] sm:$0xff]  ;;  %v2954_v5 = vld [vmem:[%s3093_s13 + $0x80] sm:$0xff] }
 0x3e1   : > { %v2517_v31 = vsel %vm2051_vm1, 1.0, %v2976_v36 }
 0x3e2   : > { %v1814_v20 = vadd.s32 %v1813_v47, %v1811_v50  ;;  %v2952_v47 = vld [vmem:[%s3093_s13 + $0x98] sm:$0xff] }
 0x3e3   : > { %v1782_v10 = vpop.xlane.xlu0 %1781 }
 0x3e4   : > { %vm2054_vm2 = vcmp.eq.s32.totalorder %v1814_v20, %v2948_v13  ;;  %v1783_v63 = vcvt.f32.s32 %v1782_v10  ;;  %v1924_v10 = vcvt.f32.s32 %v4092_v30 }
 0x3e5   : > { %v2520_v33 = vsel %vm2054_vm2, 1.0, %v2976_v36 }
 0x3e6   : > { %v2725_v59 = vpack.i.bf16 %v2520_v33, %v2519_v37  ;;  %v1786_v28 = vadd.s32 %v1785_v58, %v1783_v63  ;;  %v1827_v58 = vshll.u32 %v1826_v9, 16  ;;  %v1925_v37 = vshll.u32 %v1924_v10, 16 }
 0x3e7   : > { %v1852_v55 = vpop.xlane.xlu1 %1851  ;;  %v1866_v42 = vpop.xlane.xlu0 %1865  ;;  %v1910_v33 = vcvt.f32.s32 %v4145_v26 }
 0x3e8   : > { %vm2052_vm3 = vcmp.eq.s32.totalorder %v1786_v28, %v2950_v18  ;;  %v1853_v23 = vcvt.f32.s32 %v1852_v55  ;;  %v1867_v11 = vcvt.f32.s32 %v1866_v42  ;;  %2726 = vperm.xlu1 %2694, %v2725_v59   ;;  %v1896_v42 = vcvt.f32.s32 %v4119_v57 }
 0x3e9   : > { %v2518_v45 = vsel %vm2052_vm3, 1.0, %v2976_v36 }
 0x3ea   : > { %v2730_v7 = vpack.i.bf16 %v2518_v45, %v2517_v31  ;;  %v1856_v25 = vadd.s32 %v1855_v41, %v1853_v23  ;;  %v1870_v29 = vadd.s32 %v1869_v32, %v1867_v11  ;;  %v1911_v41 = vshll.u32 %v1910_v33, 16  ;;  %v2955_v23 = vld [vmem:[%s3093_s13 + $0xb8] sm:$0xff] }
 0x3eb   : > { %v1838_v15 = vpop.xlane.xlu0 %1837  ;;  %v1897_v31 = vshll.u32 %v1896_v42, 16  ;;  %v1882_v45 = vcvt.f32.s32 %v4169_v43  ;;  %v2959_v33 = vld [vmem:[%s3093_s13 + $0xd8] sm:$0xff] }
 0x3ec   : > { %vm2057_vm4 = vcmp.eq.s32.totalorder %v1856_v25, %v2951_v60  ;;  %vm2058_vm5 = vcmp.eq.s32.totalorder %v1870_v29, %v2952_v47  ;;  %v1839_v22 = vcvt.f32.s32 %v1838_v15  ;;  %2731 = vperm.xlu0 %2693, %v2730_v7   ;;  %v2956_v7 = vld [vmem:[%s3093_s13 + $0xb0] sm:$0xff]  ;;  %v1980_v60 = vcvt.f32.s32 %v4143_v8 }
 0x3ed   : > { %v2523_v14 = vsel %vm2057_vm4, 1.0, %v2976_v36  ;;  %v2524_v50 = vsel %vm2058_vm5, 1.0, %v2976_v36  ;;  %v1883_v47 = vshll.u32 %v1882_v45, 16  ;;  %v2962_v45 = vld [vmem:[%s3093_s13 + $0xc0] sm:$0xff]  ;;  %vm2168_vm4 = vcmp.eq.s32.totalorder %v3164_v52, 6 }
 0x3ee   : > { %v2735_v2 = vpack.i.bf16 %v2524_v50, %v2523_v14  ;;  %v1842_v39 = vadd.s32 %v1841_v16, %v1839_v22  ;;  %v2957_v14 = vld [vmem:[%s3093_s13 + $0xa8] sm:$0xff] }
 0x3ef   : > { %v1824_v20 = vpop.xlane.xlu1 %1823  ;;  %v1922_v38 = vpop.xlane.xlu0 %1921 }
 0x3f0   : > { %v1825_v34 = vcvt.f32.s32 %v1824_v20  ;;  %2736 = vperm.xlu1 %2694, %v2735_v2   ;;  %vm2056_vm6 = vcmp.eq.s32.totalorder %v1842_v39, %v2953_v21  ;;  %v1923_v63 = vcvt.f32.s32 %v1922_v38  ;;  %v1981_v2 = vshll.u32 %v1980_v60, 16  ;;  %v2958_v20 = vld [vmem:[%s3093_s13 + $0xa0] sm:$0xff] }
 0x3f1   : > { %v2522_v59 = vsel %vm2056_vm6, 1.0, %v2976_v36  ;;  %v1966_v39 = vcvt.f32.s32 %v4192_v61 }
 0x3f2   : > { %v1828_v13 = vadd.s32 %v1827_v58, %v1825_v34  ;;  %v1926_v30 = vadd.s32 %v1925_v37, %v1923_v63 }
 0x3f3   : > { %v1894_v53 = vpop.xlane.xlu0 %1893  ;;  %v1967_v63 = vshll.u32 %v1966_v39, 16  ;;  %v4881_v39 = vld [vmem:[#allocation39_spill] sm:$0xff] }
 0x3f4   : > { %vm2055_vm7 = vcmp.eq.s32.totalorder %v1828_v13, %v2954_v5  ;;  %vm2062_vm8 = vcmp.eq.s32.totalorder %v1926_v30, %v2955_v23  ;;  %v1895_v11 = vcvt.f32.s32 %v1894_v53  ;;  %v1952_v13 = vcvt.f32.s32 %v4167_v46  ;;  %v4879_v53 = vld [vmem:[#allocation109_spill] sm:$0xff] }
 0x3f5   : > { %v2521_v28 = vsel %vm2055_vm7, 1.0, %v2976_v36  ;;  %v2528_v25 = vsel %vm2062_vm8, 1.0, %v2976_v36  ;;  %2925 = vlog2.f32 %v4879_v53  ;;  %v4885_v53 = vld [vmem:[#allocation34_spill] sm:$0xff] }
 0x3f6   : > { %v2740_v32 = vpack.i.bf16 %v2522_v59, %v2521_v28  ;;  %v1898_v16 = vadd.s32 %v1897_v31, %v1895_v11  ;;  %v1953_v59 = vshll.u32 %v1952_v13, 16  ;;  %v1938_v28 = vcvt.f32.s32 %v4215_v40  ;;  %v2961_v11 = vld [vmem:[%s3093_s13 + $0xc8] sm:$0xff] }
 0x3f7   : > { %v1908_v55 = vpop.xlane.xlu1 %1907  ;;  %v1978_v15 = vpop.xlane.xlu0 %1977  ;;  %v2008_v31 = vcvt.f32.s32 %v4212_v35 }
 0x3f8   : > { %v1909_v18 = vcvt.f32.s32 %v1908_v55  ;;  %2741 = vperm.xlu0 %2693, %v2740_v32   ;;  %vm2060_vm10 = vcmp.eq.s32.totalorder %v1898_v16, %v2957_v14  ;;  %v1979_v50 = vcvt.f32.s32 %v1978_v15  ;;  %v2960_v32 = vld [vmem:[%s3093_s13 + $0xd0] sm:$0xff]  ;;  %v1994_v14 = vcvt.f32.s32 %v4242_v54  ;;  %v2963_v54 = vld [vmem:[%s3093_s13 + $0xe8] sm:$0xff] }
 0x3f9   : > { %v2526_v38 = vsel %vm2060_vm10, 1.0, %v2976_v36 }
 0x3fa   : > { %v1912_v26 = vadd.s32 %v1911_v41, %v1909_v18  ;;  %v1982_v58 = vadd.s32 %v1981_v2, %v1979_v50  ;;  %v4880_v41 = vld [vmem:[#allocation108_spill] sm:$0xff]  ;;  %v1939_v18 = vshll.u32 %v1938_v28, 16  ;;  %v4884_v28 = vld [vmem:[#allocation38_spill] sm:$0xff] }
 0x3fb   : > { %2927 = vlog2.f32 %v4880_v41 }
 0x3fc   : > { %vm2061_vm9 = vcmp.eq.s32.totalorder %v1912_v26, %v2956_v7  ;;  %vm2066_vm12 = vcmp.eq.s32.totalorder %v1982_v58, %v2959_v33  ;;  %v2922_v26 = vpop.eup %2921 }
 0x3fd   : > { %v2527_v29 = vsel %vm2061_vm9, 1.0, %v2976_v36  ;;  %v2532_v30 = vsel %vm2066_vm12, 1.0, %v2976_v36  ;;  %v1310_v15 = vmul.f32 0.6931472, %v2922_v26  ;;  %v4888_v26 = vld [vmem:[#allocation4_spill] sm:$0xff] }
 0x3fe   : > { %v2745_v57 = vpack.i.bf16 %v2528_v25, %v2527_v29  ;;  %v1950_v34 = vpop.xlane.xlu0 %1949  ;;  %v2924_v29 = vpop.eup %2923 }
 0x3ff   : > { %v1880_v9 = vpop.xlane.xlu1 %1879  ;;  %v1951_v61 = vcvt.f32.s32 %v1950_v34  ;;  %v2926_v60 = vpop.eup %2925  ;;  %v1308_v35 = vmul.f32 0.6931472, %v2924_v29  ;;  %v2022_v34 = vcvt.f32.s32 %v4257_v24  ;;  %v2966_v29 = vld [vmem:[%s3093_s13 + $0xf0] sm:$0xff] }
 0x400   : > { %v1881_v22 = vcvt.f32.s32 %v1880_v9  ;;  %2746 = vperm.xlu1 %2694, %v2745_v57  }
 0x401   : > { %v1954_v4 = vadd.s32 %v1953_v59, %v1951_v61  ;;  %v4883_v61 = vld [vmem:[#allocation40_spill] sm:$0xff] }
 0x402   : > { %v1884_v43 = vadd.s32 %v1883_v47, %v1881_v22  ;;  %v2036_v47 = vcvt.f32.s32 %v4190_v62  ;;  %v2009_v22 = vshll.u32 %v2008_v31, 16  ;;  %v4882_v62 = vld [vmem:[#allocation35_spill] sm:$0xff] }
 0x403   : > { %vm2064_vm15 = vcmp.eq.s32.totalorder %v1954_v4, %v2961_v11  ;;  %v1369_v13 = vadd.f32 %v1308_v35, %v4882_v62 }
 0x404   : > { %vm2059_vm11 = vcmp.eq.s32.totalorder %v1884_v43, %v2958_v20  ;;  %v2530_v7 = vsel %vm2064_vm15, 1.0, %v2976_v36  ;;  %v1370_v20 = vadd.f32 %v1310_v15, %v4881_v39  ;;  %v2037_v58 = vshll.u32 %v2036_v47, 16  ;;  %v4890_v15 = vld [vmem:[#allocation36_spill] sm:$0xff]  ;;  %v4892_v39 = vld [vmem:[#allocation111_spill] sm:$0xff] }
 0x405   : > { %v2525_v10 = vsel %vm2059_vm11, 1.0, %v2976_v36  ;;  %v2928_v50 = vpop.eup %2927  ;;  %v1497_v4 = vsub.f32 %v1369_v13, %v4885_v53  ;;  %v4899_v53 = vld [vmem:[#allocation49_spill] sm:$0xff] }
 0x406   : > { %v2750_v8 = vpack.i.bf16 %v2526_v38, %v2525_v10  ;;  %v1306_v38 = vmul.f32 0.6931472, %v2926_v60 }
 0x407   : > { %v1964_v21 = vpop.xlane.xlu1 %1963 }
 0x408   : > { %v1965_v37 = vcvt.f32.s32 %v1964_v21  ;;  %2751 = vperm.xlu0 %2693, %v2750_v8   ;;  %v1995_v8 = vshll.u32 %v1994_v14, 16 }
 0x40a   : > { %v1968_v5 = vadd.s32 %v1967_v63, %v1965_v37  ;;  %v1304_v63 = vmul.f32 0.6931472, %v2928_v50 }
 0x40c   : > { %vm2065_vm14 = vcmp.eq.s32.totalorder %v1968_v5, %v2960_v32  ;;  %v1498_v5 = vsub.f32 %v1370_v20, %v4883_v61  ;;  %v1368_v32 = vadd.f32 %v1306_v38, %v4884_v28  ;;  %v4893_v38 = vld [vmem:[#allocation3_spill] sm:$0xff]  ;;  %v4896_v61 = vld [vmem:[#allocation45_spill] sm:$0xff] }
 0x40d   : > { %v2531_v46 = vsel %vm2065_vm14, 1.0, %v2976_v36 }
 0x40e   : > { %v2755_v55 = vpack.i.bf16 %v2532_v30, %v2531_v46  ;;  %v2006_v23 = vpop.xlane.xlu0 %2005  ;;  %v2023_v30 = vshll.u32 %v2022_v34, 16  ;;  %v2964_v46 = vld [vmem:[%s3093_s13 + $0xe0] sm:$0xff]  ;;  %v2139_v31 = vsel %vm2135_vm13, %v1498_v5, %v4888_v26  ;;  %v4902_v26 = vld [vmem:[#allocation9_spill] sm:$0xff] }
 0x40f   : > { %v1936_v42 = vpop.xlane.xlu1 %1935  ;;  %v2007_v57 = vcvt.f32.s32 %v2006_v23 }
 0x410   : > { %v1937_v6 = vcvt.f32.s32 %v1936_v42  ;;  %2756 = vperm.xlu1 %2694, %v2755_v55   ;;  %v4886_v55 = vld [vmem:[#allocation37_spill] sm:$0xff] }
 0x411   : > { %v2010_v43 = vadd.s32 %v2009_v22, %v2007_v57  ;;  %v1367_v42 = vadd.f32 %v1304_v63, %v4886_v55  ;;  %v4891_v22 = vld [vmem:[#allocation2_spill] sm:$0xff]  ;;  %v4900_v55 = vld [vmem:[#allocation8_spill] sm:$0xff] }
 0x412   : > { %v1940_v40 = vadd.s32 %v1939_v18, %v1937_v6  ;;  %v2034_v9 = vpop.xlane.xlu0 %2033  ;;  %v2965_v6 = vld [vmem:[%s3093_s13 + $0xf8] sm:$0xff]  ;;  %v2138_v14 = vsel %vm2135_vm13, %v1497_v4, %v4891_v22 }
 0x413   : > { %v2035_v2 = vcvt.f32.s32 %v2034_v9  ;;  %vm2068_vm2 = vcmp.eq.s32.totalorder %v2010_v43, %v2963_v54  ;;  %v1495_v9 = vsub.f32 %v1367_v42, %v4890_v15  ;;  %v4895_v54 = vld [vmem:[#allocation43_spill] sm:$0xff] }
 0x414   : > { %vm2063_vm0 = vcmp.eq.s32.totalorder %v1940_v40, %v2962_v45  ;;  %v2534_v41 = vsel %vm2068_vm2, 1.0, %v2976_v36  ;;  %v4887_v40 = vld [vmem:[#allocation110_spill] sm:$0xff] }
 0x415   : > { %v2529_v25 = vsel %vm2063_vm0, 1.0, %v2976_v36  ;;  %v2038_v37 = vadd.s32 %v2037_v58, %v2035_v2  ;;  %2929 = vlog2.f32 %v4887_v40  ;;  %v4894_v58 = vld [vmem:[#allocation5_spill] sm:$0xff] }
 0x416   : > { %v2760_v16 = vpack.i.bf16 %v2530_v7, %v2529_v25  ;;  %v4889_v7 = vld [vmem:[#allocation41_spill] sm:$0xff]  ;;  %2931 = vlog2.f32 %v4892_v39 }
 0x417   : > { %vm2070_vm3 = vcmp.eq.s32.totalorder %v2038_v37, %v2965_v6  ;;  %v1496_v25 = vsub.f32 %v1368_v32, %v4889_v7  ;;  %v4903_v7 = vld [vmem:[#allocation6_spill] sm:$0xff] }
 0x418   : > { %2761 = vperm.xlu0 %2693, %v2760_v16   ;;  %v2536_v60 = vsel %vm2070_vm3, 1.0, %v2976_v36 }
 0x41b   : > { %v1992_v10 = vpop.xlane.xlu1 %1991 }
 0x41c   : > { %v1993_v21 = vcvt.f32.s32 %v1992_v10  ;;  %v2136_v10 = vsel %vm2135_vm13, %v1495_v9, %v4893_v38  ;;  %v4905_v9 = vld [vmem:[#allocation53_spill] sm:$0xff] }
 0x41e   : > { %v1996_v33 = vadd.s32 %v1995_v8, %v1993_v21  ;;  %v2137_v8 = vsel %vm2135_vm13, %v1496_v25, %v4894_v58 }
 0x41f   : > { %v2020_v59 = vpop.xlane.xlu1 %2019  ;;  %v2930_v62 = vpop.eup %2929 }
 0x420   : > { %vm2067_vm1 = vcmp.eq.s32.totalorder %v1996_v33, %v2964_v46  ;;  %v2021_v24 = vcvt.f32.s32 %v2020_v59  ;;  %v1318_v13 = vmul.f32 0.6931472, %v2930_v62  ;;  %v2932_v63 = vpop.eup %2931  ;;  %v4897_v59 = vld [vmem:[#allocation47_spill] sm:$0xff] }
 0x421   : > { %v2533_v18 = vsel %vm2067_vm1, 1.0, %v2976_v36  ;;  %v1314_v33 = vmul.f32 0.6931472, %v2932_v63 }
 0x422   : > { %v2765_v23 = vpack.i.bf16 %v2534_v41, %v2533_v18  ;;  %v2024_v11 = vadd.s32 %v2023_v30, %v2021_v24  ;;  %v1374_v37 = vadd.f32 %v1318_v13, %v4895_v54  ;;  %v4898_v30 = vld [vmem:[#allocation112_spill] sm:$0xff]  ;;  %v4909_v13 = vld [vmem:[#allocation7_spill] sm:$0xff]  ;;  %v4910_v54 = vld [vmem:[#allocation57_spill] sm:$0xff] }
 0x423   : > { %v2697_v45 = vpop.permute.xlu0 %2696  ;;  %v1372_v28 = vadd.f32 %v1314_v33, %v4897_v59  ;;  %2933 = vlog2.f32 %v4898_v30  ;;  %v4901_v18 = vld [vmem:[#allocation68_spill] sm:$0xff] }
 0x424   : > { %vm2069_vm5 = vcmp.eq.s32.totalorder %v2024_v11, %v2966_v29  ;;  %v2699_v16 = vunpack.i.h.bf16 %v2697_v45  ;;  %v2698_v57 = vunpack.i.l.bf16 %v2697_v45  ;;  %2766 = vperm.xlu0 %2693, %v2765_v23   ;;  %v1502_v5 = vsub.f32 %v1374_v37, %v4896_v61 }
 0x425   : > { %v2535_v47 = vsel %vm2069_vm5, 1.0, %v2976_v36  ;;  %v1500_v4 = vsub.f32 %v1372_v28, %v4899_v53 }
 0x426   : > { %v2770_v35 = vpack.i.bf16 %v2536_v60, %v2535_v47  ;;  %v2332_v50 = vsel %vm2168_vm4, %v2699_v16, %v2139_v31  ;;  %v2331_v43 = vsel %vm2168_vm4, %v2698_v57, %v2138_v14  ;;  %v2143_v42 = vsel %vm2135_vm13, %v1502_v5, %v4900_v55  ;;  %v4904_v57 = vld [vmem:[#allocation51_spill] sm:$0xff]  ;;  %v4911_v5 = vld [vmem:[#allocation60_spill] sm:$0xff] }
 0x427   : > { %2364 = vst [vmem:[%s4430_s17 + $0x18] sm:$0xff] %v2332_v50  ;;  %2363 = vst [vmem:[%s4430_s17 + $0x10] sm:$0xff] %v2331_v43  ;;  %v2702_v2 = vpop.permute.xlu1 %2701  ;;  %v2141_v31 = vsel %vm2135_vm13, %v1500_v4, %v4902_v26 }
 0x428   : > { %v2704_v20 = vunpack.i.h.bf16 %v2702_v2  ;;  %v2703_v36 = vunpack.i.l.bf16 %v2702_v2  ;;  %2771 = vperm.xlu1 %2694, %v2770_v35   ;;  %v4906_v35 = vld [vmem:[#allocation12_spill] sm:$0xff] }
 0x429   : > { %v4907_v2 = vld [vmem:[#allocation44_spill] sm:$0xff] }
 0x42a   : > { %v2330_v34 = vsel %vm2168_vm4, %v2704_v20, %v2137_v8  ;;  %v2329_v21 = vsel %vm2168_vm4, %v2703_v36, %v2136_v10  ;;  %v4908_v10 = vld [vmem:[#allocation42_spill] sm:$0xff] }
 0x42b   : > { %2362 = vst [vmem:[%s4430_s17 + $0x8] sm:$0xff] %v2330_v34  ;;  %2361 = vst [vmem:[%s4430_s17] sm:$0xff] %v2329_v21 }
 0x42d   : > { %v2934_v29 = vpop.eup %2933 }
 0x42e   : > { %v1326_v16 = vmul.f32 0.6931472, %v2934_v29 }
 0x430   : > { %v1378_v15 = vadd.f32 %v1326_v16, %v4904_v57 }
 0x432   : > { %v1506_v60 = vsub.f32 %v1378_v15, %v4905_v9  ;;  %v4916_v9 = vld [vmem:[#allocation46_spill] sm:$0xff] }
 0x434   : > { %v2147_v50 = vsel %vm2135_vm13, %v1506_v60, %v4906_v35  ;;  %v4917_v35 = vld [vmem:[#allocation74_spill] sm:$0xff] }
 0x43b   : > { %v2707_v32 = vpop.permute.xlu1 %2706 }
 0x43c   : > { %v2709_v46 = vunpack.i.h.bf16 %v2707_v32  ;;  %v2708_v24 = vunpack.i.l.bf16 %v2707_v32 }
 0x43e   : > { %v2336_v41 = vsel %vm2168_vm4, %v2709_v46, %v2143_v42  ;;  %v2335_v6 = vsel %vm2168_vm4, %v2708_v24, %v4901_v18  ;;  %v4912_v24 = vld [vmem:[#allocation55_spill] sm:$0xff] }
 0x43f   : > { %2368 = vst [vmem:[%s4430_s17 + $0x38] sm:$0xff] %v2336_v41  ;;  %2367 = vst [vmem:[%s4430_s17 + $0x30] sm:$0xff] %v2335_v6  ;;  %v2712_v23 = vpop.permute.xlu1 %2711  ;;  %v4913_v41 = vld [vmem:[#allocation63_spill] sm:$0xff] }
 0x440   : > { %v2714_v11 = vunpack.i.h.bf16 %v2712_v23  ;;  %v2713_v40 = vunpack.i.l.bf16 %v2712_v23 }
 0x442   : > { %v2334_v45 = vsel %vm2168_vm4, %v2714_v11, %v2141_v31  ;;  %v2333_v25 = vsel %vm2168_vm4, %v2713_v40, %v4903_v7  ;;  %v4914_v40 = vld [vmem:[#allocation13_spill] sm:$0xff] }
 0x443   : > { %2366 = vst [vmem:[%s4430_s17 + $0x28] sm:$0xff] %v2334_v45  ;;  %2365 = vst [vmem:[%s4430_s17 + $0x20] sm:$0xff] %v2333_v25  ;;  %v4915_v25 = vld [vmem:[#allocation71_spill] sm:$0xff] }
 0x453   : > { %v2717_v47 = vpop.permute.xlu1 %2716 }
 0x454   : > { %v2719_v22 = vunpack.i.h.bf16 %v2717_v47  ;;  %v2718_v14 = vunpack.i.l.bf16 %v2717_v47 }
 0x456   : > { %v2340_v43 = vsel %vm2168_vm4, %v2719_v22, %v2147_v50  ;;  %v2339_v39 = vsel %vm2168_vm4, %v2718_v14, %v4907_v2 }
 0x457   : > { %2372 = vst [vmem:[%s4430_s17 + $0x58] sm:$0xff] %v2340_v43  ;;  %2371 = vst [vmem:[%s4430_s17 + $0x50] sm:$0xff] %v2339_v39  ;;  %v2722_v20 = vpop.permute.xlu0 %2721 }
 0x458   : > { %v2724_v36 = vunpack.i.h.bf16 %v2722_v20  ;;  %v2723_v38 = vunpack.i.l.bf16 %v2722_v20 }
 0x45a   : > { %v2338_v58 = vsel %vm2168_vm4, %v2724_v36, %v4908_v10  ;;  %v2337_v8 = vsel %vm2168_vm4, %v2723_v38, %v4131_v12 }
 0x45b   : > { %2370 = vst [vmem:[%s4430_s17 + $0x48] sm:$0xff] %v2338_v58  ;;  %2369 = vst [vmem:[%s4430_s17 + $0x40] sm:$0xff] %v2337_v8 }
 0x467   : > { %v2727_v34 = vpop.permute.xlu1 %2726 }
 0x468   : > { %v2729_v21 = vunpack.i.h.bf16 %v2727_v34  ;;  %v2728_v62 = vunpack.i.l.bf16 %v2727_v34 }
 0x46a   : > { %v2344_v63 = vsel %vm2168_vm4, %v2729_v21, %v4909_v13  ;;  %v2343_v37 = vsel %vm2168_vm4, %v2728_v62, %v4910_v54 }
 0x46b   : > { %2376 = vst [vmem:[%s4430_s17 + $0x78] sm:$0xff] %v2344_v63  ;;  %2375 = vst [vmem:[%s4430_s17 + $0x70] sm:$0xff] %v2343_v37  ;;  %v2732_v33 = vpop.permute.xlu0 %2731 }
 0x46c   : > { %v2734_v12 = vunpack.i.h.bf16 %v2732_v33  ;;  %v2733_v61 = vunpack.i.l.bf16 %v2732_v33 }
 0x46e   : > { %v2342_v59 = vsel %vm2168_vm4, %v2734_v12, %v4911_v5  ;;  %v2341_v28 = vsel %vm2168_vm4, %v2733_v61, %v4188_v48 }
 0x46f   : > { %2374 = vst [vmem:[%s4430_s17 + $0x68] sm:$0xff] %v2342_v59  ;;  %2373 = vst [vmem:[%s4430_s17 + $0x60] sm:$0xff] %v2341_v28  ;;  %v2737_v32 = vpop.permute.xlu1 %2736 }
 0x470   : > { %v2739_v30 = vunpack.i.h.bf16 %v2737_v32  ;;  %v2738_v46 = vunpack.i.l.bf16 %v2737_v32 }
 0x472   : > { %v2348_v53 = vsel %vm2168_vm4, %v2739_v30, %v4912_v24  ;;  %v2347_v4 = vsel %vm2168_vm4, %v2738_v46, %v4210_v19 }
 0x473   : > { %2380 = vst [vmem:[%s4430_s17 + $0x98] sm:$0xff] %v2348_v53  ;;  %2379 = vst [vmem:[%s4430_s17 + $0x90] sm:$0xff] %v2347_v4 }
 0x477   : > { %v2742_v55 = vpop.permute.xlu0 %2741 }
 0x478   : > { %v2744_v48 = vunpack.i.h.bf16 %v2742_v55  ;;  %v2743_v42 = vunpack.i.l.bf16 %v2742_v55 }
 0x47a   : > { %v2346_v18 = vsel %vm2168_vm4, %v2744_v48, %v4913_v41  ;;  %v2345_v6 = vsel %vm2168_vm4, %v2743_v42, %v4235_v1 }
 0x47b   : > { %2378 = vst [vmem:[%s4430_s17 + $0x88] sm:$0xff] %v2346_v18  ;;  %2377 = vst [vmem:[%s4430_s17 + $0x80] sm:$0xff] %v2345_v6 }
 0x47f   : > { %v2747_v23 = vpop.permute.xlu1 %2746 }
 0x480   : > { %v2749_v19 = vunpack.i.h.bf16 %v2747_v23  ;;  %v2748_v11 = vunpack.i.l.bf16 %v2747_v23 }
 0x482   : > { %v2352_v26 = vsel %vm2168_vm4, %v2749_v19, %v4914_v40  ;;  %v2351_v31 = vsel %vm2168_vm4, %v2748_v11, %v4255_v0 }
 0x483   : > { %2384 = vst [vmem:[%s4430_s17 + $0xb8] sm:$0xff] %v2352_v26  ;;  %2383 = vst [vmem:[%s4430_s17 + $0xb0] sm:$0xff] %v2351_v31 }
 0x487   : > { %v2752_v45 = vpop.permute.xlu0 %2751 }
 0x488   : > { %v2754_v1 = vunpack.i.h.bf16 %v2752_v45  ;;  %v2753_v7 = vunpack.i.l.bf16 %v2752_v45 }
 0x48a   : > { %v2350_v29 = vsel %vm2168_vm4, %v2754_v1, %v4915_v25  ;;  %v2349_v16 = vsel %vm2168_vm4, %v2753_v7, %v4276_v56 }
 0x48b   : > { %2382 = vst [vmem:[%s4430_s17 + $0xa8] sm:$0xff] %v2350_v29  ;;  %2381 = vst [vmem:[%s4430_s17 + $0xa0] sm:$0xff] %v2349_v16 }
 0x48f   : > { %v2757_v57 = vpop.permute.xlu1 %2756 }
 0x490   : > { %v2759_v0 = vunpack.i.h.bf16 %v2757_v57  ;;  %v2758_v15 = vunpack.i.l.bf16 %v2757_v57 }
 0x492   : > { %v2356_v60 = vsel %vm2168_vm4, %v2759_v0, %v4916_v9  ;;  %v2355_v47 = vsel %vm2168_vm4, %v2758_v15, %v4286_v27 }
 0x493   : > { %2388 = vst [vmem:[%s4430_s17 + $0xd8] sm:$0xff] %v2356_v60  ;;  %2387 = vst [vmem:[%s4430_s17 + $0xd0] sm:$0xff] %v2355_v47 }
 0x497   : > { %v2762_v22 = vpop.permute.xlu0 %2761 }
 0x498   : > { %v2764_v56 = vunpack.i.h.bf16 %v2762_v22  ;;  %v2763_v14 = vunpack.i.l.bf16 %v2762_v22 }
 0x49a   : > { %v2354_v50 = vsel %vm2168_vm4, %v2764_v56, %v4917_v35  ;;  %v2353_v43 = vsel %vm2168_vm4, %v2763_v14, %v4314_v51 }
 0x49b   : > { %2386 = vst [vmem:[%s4430_s17 + $0xc8] sm:$0xff] %v2354_v50  ;;  %2385 = vst [vmem:[%s4430_s17 + $0xc0] sm:$0xff] %v2353_v43 }
 0x4a3   : > { %v2767_v2 = vpop.permute.xlu0 %2766 }
 0x4a4   : > { %v2769_v27 = vunpack.i.h.bf16 %v2767_v2  ;;  %v2768_v39 = vunpack.i.l.bf16 %v2767_v2 }
 0x4a6   : > { %v2358_v20 = vsel %vm2168_vm4, %v2769_v27, %v4298_v44  ;;  %v2357_v36 = vsel %vm2168_vm4, %v2768_v39, %v4328_v17 }
 0x4a7   : > { %2390 = vst [vmem:[%s4430_s17 + $0xe8] sm:$0xff] %v2358_v20  ;;  %2389 = vst [vmem:[%s4430_s17 + $0xe0] sm:$0xff] %v2357_v36  ;;  %v2772_v38 = vpop.permute.xlu1 %2771 }
 0x4a8   : > { %v2774_v10 = vunpack.i.h.bf16 %v2772_v38  ;;  %v2773_v58 = vunpack.i.l.bf16 %v2772_v38 }
 0x4aa   : > { %v2360_v51 = vsel %vm2168_vm4, %v2774_v10, %v4291_v3  ;;  %v2359_v8 = vsel %vm2168_vm4, %v2773_v58, %v4321_v49 }
 0x4ab   : > { %2392 = vst [vmem:[%s4430_s17 + $0xf8] sm:$0xff] %v2360_v51  ;;  %2391 = vst [vmem:[%s4430_s17 + $0xf0] sm:$0xff] %v2359_v8 }
 0x4ac PF: > { %s15_s18 = sadd.s32 1, %s2973_s18  }
 0x4ad   : > { %p12_p4 = scmp.ge.s32.totalorder %s15_s18, 4  }
 0x4af   :  { %14 = sbr.rel (!%p12_p4) target bundleno = 1 (0x1), region = 73 }

</bundles_post_ra>
